<compile_context>
chip_gen: v7x
topology: tpu7x:2x2x1
jax: 0.10.0
libtpu: 0.0.40
codegen_flags: <defaults>
</compile_context>

<pallas_src>
import functools

import jax
import jax.numpy as jnp
from jax.experimental import pallas as pl
from jax.experimental.pallas import tpu as pltpu


# --------------------------- parameter prep (hoisted) ------------------------
def _w_to_taps(w, dtype):
    """OIHW (Cout, Cin, 3, 3) -> (9, Cin, Cout); tap index = ky*3 + kx."""
    cout, cin = w.shape[0], w.shape[1]
    return jnp.transpose(w, (2, 3, 1, 0)).reshape(9, cin, cout).astype(dtype)


def prepare_params(params, downsample_op, use_bf16_mxu=True):
    """One-time re-layout of PyTorch OIHW weights into per-tap matmul matrices."""
    if downsample_op not in ("max_pool", "strided_conv"):
        raise ValueError(downsample_op)
    op_dtype = jnp.bfloat16 if use_bf16_mxu else jnp.float32
    w1, b1, w2, b2 = params["w1"], params["b1"], params["w2"], params["b2"]
    cout = w1.shape[0]
    return dict(
        op=downsample_op,
        op_dtype=op_dtype,
        w1=_w_to_taps(w1, op_dtype),
        b1=b1.reshape(1, cout).astype(jnp.float32),
        w2=_w_to_taps(w2, op_dtype),
        b2=b2.reshape(1, cout).astype(jnp.float32),
    )


# -------------------------------- fused kernel -------------------------------
def _fused_downconv_kernel(x_ref, w1_ref, b1_ref, w2_ref, b2_ref, o_ref,
                           pad1_ref, pad2_ref, *, pool):
    # x_ref : (1, 4, Ho, Wo, Cin)  grouped space-to-depth input slab
    #         group g = gy*2 + gx  holds pixel (2i+gy, 2j+gx).
    # w1_ref: (9, K1, Cout) per-tap conv1 weights   b1_ref: (1, Cout) f32
    # w2_ref: (9, Cout, Cout) per-tap conv2 weights b2_ref: (1, Cout) f32
    # o_ref : (1, Ho, Wo, Cout)
    # pad1_ref / pad2_ref: zero-halo VMEM scratch (operand dtype).
    _, ho, wo, cout = o_ref.shape
    dt = pad1_ref.dtype
    cin = pad1_ref.shape[-1]

    def tap_accum(slabs, w_ref):
        # 9 accumulated matmuls in f32 (single running accumulator); on v7x the
        # MRB accumulates in place, on v5e/v6e the adds are cheap VPU work.
        acc = None
        for t, slab in enumerate(slabs):
            contrib = jnp.dot(slab.reshape(ho * wo, slab.shape[-1]), w_ref[t],
                              preferred_element_type=jnp.float32)
            acc = contrib if acc is None else acc + contrib
        return acc

    # ---- conv1 input halo scratch; zero only the 1-pixel border each step,
    #      the interior is fully overwritten below.
    if pool:
        # MaxPool2d(2, 2) = elementwise max of the four pixel-group slabs (VPU).
        pooled = jnp.maximum(jnp.maximum(x_ref[0, 0], x_ref[0, 1]),
                             jnp.maximum(x_ref[0, 2], x_ref[0, 3]))
        pad1_ref[0:1, :, :] = jnp.zeros((1, wo + 2, cin), dt)
        pad1_ref[ho + 1:ho + 2, :, :] = jnp.zeros((1, wo + 2, cin), dt)
        pad1_ref[:, 0:1, :] = jnp.zeros((ho + 2, 1, cin), dt)
        pad1_ref[:, wo + 1:wo + 2, :] = jnp.zeros((ho + 2, 1, cin), dt)
        pad1_ref[1:ho + 1, 1:wo + 1, :] = pooled.astype(dt)
        xp1 = pad1_ref[...]
        # Standard 3x3 stride-1 pad-1 taps over the pooled map.
        slabs1 = [xp1[dy:dy + ho, dx:dx + wo, :]
                  for dy in range(3) for dx in range(3)]
    else:
        # Stride-2 pad-1 3x3 conv over the space-to-depth slab: only the 9
        # nonzero (tap, group) combinations (K = 9*Cin, not 16*Cin).
        for g in range(4):
            pad1_ref[g, 0:1, :, :] = jnp.zeros((1, wo + 1, cin), dt)
            pad1_ref[g, :, 0:1, :] = jnp.zeros((ho + 1, 1, cin), dt)
            pad1_ref[g, 1:ho + 1, 1:wo + 1, :] = x_ref[0, g].astype(dt)
        xp1 = pad1_ref[...]
        slabs1 = []
        for ky in range(3):
            oy, gy = (ky - 1) // 2, 1 - (ky % 2)   # ky: 0->(-1,1) 1->(0,0) 2->(0,1)
            for kx in range(3):
                ox, gx = (kx - 1) // 2, 1 - (kx % 2)
                slabs1.append(xp1[gy * 2 + gx,
                                  1 + oy:1 + oy + ho,
                                  1 + ox:1 + ox + wo, :])

    # ---- conv1: tap-accumulated matmuls + bias + ReLU (f32 accumulate)
    h1 = jnp.maximum(tap_accum(slabs1, w1_ref) + b1_ref[...], 0.0)  # (Ho*Wo, Cout)

    # ---- conv2: 3x3 stride-1 pad-1, same tap-accumulation scheme
    pad2_ref[0:1, :, :] = jnp.zeros((1, wo + 2, cout), dt)
    pad2_ref[ho + 1:ho + 2, :, :] = jnp.zeros((1, wo + 2, cout), dt)
    pad2_ref[:, 0:1, :] = jnp.zeros((ho + 2, 1, cout), dt)
    pad2_ref[:, wo + 1:wo + 2, :] = jnp.zeros((ho + 2, 1, cout), dt)
    pad2_ref[1:ho + 1, 1:wo + 1, :] = h1.reshape(ho, wo, cout).astype(dt)
    xp2 = pad2_ref[...]
    slabs2 = [xp2[dy:dy + ho, dx:dx + wo, :]
              for dy in range(3) for dx in range(3)]
    h2 = jnp.maximum(tap_accum(slabs2, w2_ref) + b2_ref[...], 0.0)
    o_ref[0] = h2.reshape(ho, wo, cout).astype(o_ref.dtype)


# ------------------------------ DownConv forward -----------------------------
def down_conv_forward(x_nchw, prepared):
    """Fused DownConv forward. x_nchw: (N, Cin, H, W) -> (N, Cout, H//2, W//2)."""
    n, cin, h, w = x_nchw.shape
    assert h % 2 == 0 and w % 2 == 0, "DownConv kernel assumes even H and W"
    ho, wo = h // 2, w // 2
    w1, b1, w2, b2 = prepared["w1"], prepared["b1"], prepared["w2"], prepared["b2"]
    cout = b1.shape[-1]
    pool = prepared["op"] == "max_pool"
    dt = prepared["op_dtype"]

    # NCHW -> grouped space-to-depth slab (N, 4, Ho, Wo, Cin), channels-last,
    # cast to the MXU operand dtype in the same pass (no extra HBM pass for bf16):
    #   xs[n, gy*2+gx, i, j, c] = x[n, c, 2i+gy, 2j+gx]
    # TODO(synk): a production pipeline should keep activations channels-last
    # end-to-end so this relayout and the final NHWC->NCHW transpose (two full
    # HBM passes) disappear; the module's PyTorch NCHW interface forces them here.
    xs = x_nchw.reshape(n, cin, ho, 2, wo, 2)
    xs = jnp.transpose(xs, (0, 3, 5, 2, 4, 1)).reshape(n, 4, ho, wo, cin).astype(dt)

    pad1_shape = (ho + 2, wo + 2, cin) if pool else (4, ho + 1, wo + 1, cin)
    pad2_shape = (ho + 2, wo + 2, cout)

    # Explicit scoped-VMEM budget: double-buffered blocks + weights + scratch +
    # matmul operands/accumulators, with 2x headroom.
    def nbytes(shape, dtype):
        sz = 1
        for s in shape:
            sz *= int(s)
        return sz * jnp.dtype(dtype).itemsize

    est = (2 * nbytes((1, 4, ho, wo, cin), dt)
           + 2 * nbytes((1, ho, wo, cout), x_nchw.dtype)
           + nbytes(w1.shape, dt) + nbytes(w2.shape, dt)
           + nbytes(pad1_shape, dt) + nbytes(pad2_shape, dt)
           + 2 * nbytes((ho * wo, max(cin, cout)), dt)
           + 2 * nbytes((ho * wo, cout), jnp.float32))
    vmem_limit = int(min(max(2 * est, 32 * 1024 * 1024), 64 * 1024 * 1024))

    out_nhwc = pl.pallas_call(
        functools.partial(_fused_downconv_kernel, pool=pool),
        out_shape=jax.ShapeDtypeStruct((n, ho, wo, cout), x_nchw.dtype),
        grid=(n,),
        in_specs=[
            pl.BlockSpec((1, 4, ho, wo, cin), lambda i: (i, 0, 0, 0, 0)),
            pl.BlockSpec(w1.shape, lambda i: (0, 0, 0)),
            pl.BlockSpec(b1.shape, lambda i: (0, 0)),
            pl.BlockSpec(w2.shape, lambda i: (0, 0, 0)),
            pl.BlockSpec(b2.shape, lambda i: (0, 0)),
        ],
        out_specs=pl.BlockSpec((1, ho, wo, cout), lambda i: (i, 0, 0, 0)),
        scratch_shapes=[
            pltpu.VMEM(pad1_shape, dt),
            pltpu.VMEM(pad2_shape, dt),
        ],
        compiler_params=pltpu.CompilerParams(
            dimension_semantics=("parallel",),
            vmem_limit_bytes=vmem_limit),
    )(xs, w1, b1, w2, b2)

    # TODO(synk): at production H/W/C add a halo'd spatial row-tile grid axis
    # (also "parallel", so both v7x TensorCores stay busy at batch=1) with tile
    # sizes re-derived per generation (64 MiB VMEM on v7x vs 128 MiB v5e/v6e);
    # whole-image blocks are the right choice at these demo shapes.
    return jnp.transpose(out_nhwc, (0, 3, 1, 2))   # NHWC -> NCHW (PyTorch layout)


# --------------------------- pure-JAX reference check ------------------------
def _ref_forward(x_nchw, params, downsample_op):
    x = x_nchw
    if downsample_op == "max_pool":
        x = jax.lax.reduce_window(x, -jnp.inf, jax.lax.max,
                                  (1, 1, 2, 2), (1, 1, 2, 2), "VALID")
        s1 = 1
    else:
        s1 = 2

    def conv(y, wgt, bias, s):
        z = jax.lax.conv_general_dilated(
            y, wgt, (s, s), ((1, 1), (1, 1)),
            dimension_numbers=("NCHW", "OIHW", "NCHW"))
        return jax.nn.relu(z + bias[None, :, None, None])

    x = conv(x, params["w1"], params["b1"], s1)
    x = conv(x, params["w2"], params["b2"], 1)
    return x


if __name__ == "__main__":
    key = jax.random.PRNGKey(0)
    in_channels, out_channels = 4, 8
    n, h, w = 2, 16, 16

    k0, k1, k2, k3, k4 = jax.random.split(key, 5)
    x = jax.random.normal(k0, (n, in_channels, h, w), jnp.float32)

    # Deterministic init mimicking PyTorch Conv2d default (uniform +-1/sqrt(fan_in)).
    def conv_init(kw, kb, cin, cout):
        bound = 1.0 / float(jnp.sqrt(cin * 9.0))
        wgt = jax.random.uniform(kw, (cout, cin, 3, 3), jnp.float32, -bound, bound)
        bias = jax.random.uniform(kb, (cout,), jnp.float32, -bound, bound)
        return wgt, bias

    w1, b1 = conv_init(k1, k2, in_channels, out_channels)
    w2, b2 = conv_init(k3, k4, out_channels, out_channels)
    params = dict(w1=w1, b1=b1, w2=w2, b2=b2)

    for op in ("max_pool", "strided_conv"):
        ref = _ref_forward(x, params, op)
        ref_scale = 1.0 + float(jnp.max(jnp.abs(ref)))

        # Bit-accurate path (f32 MXU operands).
        prepared = prepare_params(params, op, use_bf16_mxu=False)
        out = jax.block_until_ready(down_conv_forward(x, prepared))
        assert out.shape == (n, out_channels, h // 2, w // 2), (op, out.shape)
        err = float(jnp.max(jnp.abs(out - ref)))
        assert err < 1e-4, ("f32", op, err)

        # Fast path (bf16 MXU operands, f32 accumulation) -> relaxed tolerance.
        prepared = prepare_params(params, op, use_bf16_mxu=True)
        out = jax.block_until_ready(down_conv_forward(x, prepared))
        err = float(jnp.max(jnp.abs(out - ref)))
        assert err < 5e-2 * ref_scale, ("bf16", op, err)

    print("KERNEL_OK")
</pallas_src>

<mosaic_0001>
module attributes {stable_mosaic.version = 11 : i64} {
  func.func @_fused_downconv_kernel(%arg0: i32, %arg1: memref<1x4x8x8x4xf32, #tpu.memory_space<vmem>>, %arg2: memref<9x4x8xf32, #tpu.memory_space<vmem>>, %arg3: memref<1x8xf32, #tpu.memory_space<vmem>>, %arg4: memref<9x8x8xf32, #tpu.memory_space<vmem>>, %arg5: memref<1x8xf32, #tpu.memory_space<vmem>>, %arg6: memref<1x8x8x8xf32, #tpu.memory_space<vmem>>, %arg7: memref<10x10x4xf32, #tpu.memory_space<vmem>>, %arg8: memref<10x10x8xf32, #tpu.memory_space<vmem>>) attributes {dimension_semantics = [#tpu.dimension_semantics<parallel>], iteration_bounds = array<i64: 2>, scalar_prefetch = 0 : i64, scratch_operands = 2 : i64, tpu.core_type = #tpu.core_type<tc>, window_params = [{transform_indices = @transform_0, window_bounds = array<i64: 1, 4, 8, 8, 4>}, {pipeline_mode = #tpu.pipeline_mode<synchronous>, transform_indices = @transform_1, window_bounds = array<i64: 9, 4, 8>}, {pipeline_mode = #tpu.pipeline_mode<synchronous>, transform_indices = @transform_2, window_bounds = array<i64: 1, 8>}, {pipeline_mode = #tpu.pipeline_mode<synchronous>, transform_indices = @transform_3, window_bounds = array<i64: 9, 8, 8>}, {pipeline_mode = #tpu.pipeline_mode<synchronous>, transform_indices = @transform_4, window_bounds = array<i64: 1, 8>}, {transform_indices = @transform_5, window_bounds = array<i64: 1, 8, 8, 8>}]} {
    %c0 = arith.constant 0 : index
    %c0_0 = arith.constant 0 : index
    %c0_1 = arith.constant 0 : index
    %c0_2 = arith.constant 0 : index
    %c0_3 = arith.constant 0 : index
    %0 = vector.load %arg1[%c0, %c0_0, %c0_1, %c0_2, %c0_3] : memref<1x4x8x8x4xf32, #tpu.memory_space<vmem>>, vector<1x1x8x8x4xf32>
    %1 = vector.shape_cast %0 : vector<1x1x8x8x4xf32> to vector<8x8x4xf32>
    %c0_4 = arith.constant 0 : index
    %c1 = arith.constant 1 : index
    %c0_5 = arith.constant 0 : index
    %c0_6 = arith.constant 0 : index
    %c0_7 = arith.constant 0 : index
    %2 = vector.load %arg1[%c0_4, %c1, %c0_5, %c0_6, %c0_7] : memref<1x4x8x8x4xf32, #tpu.memory_space<vmem>>, vector<1x1x8x8x4xf32>
    %3 = vector.shape_cast %2 : vector<1x1x8x8x4xf32> to vector<8x8x4xf32>
    %4 = arith.maximumf %1, %3 : vector<8x8x4xf32>
    %c0_8 = arith.constant 0 : index
    %c2 = arith.constant 2 : index
    %c0_9 = arith.constant 0 : index
    %c0_10 = arith.constant 0 : index
    %c0_11 = arith.constant 0 : index
    %5 = vector.load %arg1[%c0_8, %c2, %c0_9, %c0_10, %c0_11] : memref<1x4x8x8x4xf32, #tpu.memory_space<vmem>>, vector<1x1x8x8x4xf32>
    %6 = vector.shape_cast %5 : vector<1x1x8x8x4xf32> to vector<8x8x4xf32>
    %c0_12 = arith.constant 0 : index
    %c3 = arith.constant 3 : index
    %c0_13 = arith.constant 0 : index
    %c0_14 = arith.constant 0 : index
    %c0_15 = arith.constant 0 : index
    %7 = vector.load %arg1[%c0_12, %c3, %c0_13, %c0_14, %c0_15] : memref<1x4x8x8x4xf32, #tpu.memory_space<vmem>>, vector<1x1x8x8x4xf32>
    %8 = vector.shape_cast %7 : vector<1x1x8x8x4xf32> to vector<8x8x4xf32>
    %9 = arith.maximumf %6, %8 : vector<8x8x4xf32>
    %10 = arith.maximumf %4, %9 : vector<8x8x4xf32>
    %cst = arith.constant 0.000000e+00 : f32
    %11 = vector.broadcast %cst : f32 to vector<1x10x4xf32>
    %c0_16 = arith.constant 0 : index
    %c0_17 = arith.constant 0 : index
    %c0_18 = arith.constant 0 : index
    %12 = vector.load %arg7[%c0_16, %c0_17, %c0_18] : memref<10x10x4xf32, #tpu.memory_space<vmem>>, vector<1x10x4xf32>
    tpu.vector_store %arg7[%c0_16, %c0_17, %c0_18], %11 {strides = array<i32>} : memref<10x10x4xf32, #tpu.memory_space<vmem>>, vector<1x10x4xf32>,
    %cst_19 = arith.constant 0.000000e+00 : f32
    %13 = vector.broadcast %cst_19 : f32 to vector<1x10x4xf32>
    %c9 = arith.constant 9 : index
    %c0_20 = arith.constant 0 : index
    %c0_21 = arith.constant 0 : index
    %14 = vector.load %arg7[%c9, %c0_20, %c0_21] : memref<10x10x4xf32, #tpu.memory_space<vmem>>, vector<1x10x4xf32>
    tpu.vector_store %arg7[%c9, %c0_20, %c0_21], %13 {strides = array<i32>} : memref<10x10x4xf32, #tpu.memory_space<vmem>>, vector<1x10x4xf32>,
    %cst_22 = arith.constant 0.000000e+00 : f32
    %15 = vector.broadcast %cst_22 : f32 to vector<10x1x4xf32>
    %c0_23 = arith.constant 0 : index
    %c0_24 = arith.constant 0 : index
    %c0_25 = arith.constant 0 : index
    %16 = vector.load %arg7[%c0_23, %c0_24, %c0_25] : memref<10x10x4xf32, #tpu.memory_space<vmem>>, vector<10x1x4xf32>
    tpu.vector_store %arg7[%c0_23, %c0_24, %c0_25], %15 {strides = array<i32>} : memref<10x10x4xf32, #tpu.memory_space<vmem>>, vector<10x1x4xf32>,
    %cst_26 = arith.constant 0.000000e+00 : f32
    %17 = vector.broadcast %cst_26 : f32 to vector<10x1x4xf32>
    %c0_27 = arith.constant 0 : index
    %c9_28 = arith.constant 9 : index
    %c0_29 = arith.constant 0 : index
    %18 = vector.load %arg7[%c0_27, %c9_28, %c0_29] : memref<10x10x4xf32, #tpu.memory_space<vmem>>, vector<10x1x4xf32>
    tpu.vector_store %arg7[%c0_27, %c9_28, %c0_29], %17 {strides = array<i32>} : memref<10x10x4xf32, #tpu.memory_space<vmem>>, vector<10x1x4xf32>,
    %c1_30 = arith.constant 1 : index
    %c1_31 = arith.constant 1 : index
    %c0_32 = arith.constant 0 : index
    %19 = vector.load %arg7[%c1_30, %c1_31, %c0_32] : memref<10x10x4xf32, #tpu.memory_space<vmem>>, vector<8x8x4xf32>
    tpu.vector_store %arg7[%c1_30, %c1_31, %c0_32], %10 {strides = array<i32>} : memref<10x10x4xf32, #tpu.memory_space<vmem>>, vector<8x8x4xf32>,
    %c0_33 = arith.constant 0 : index
    %c0_34 = arith.constant 0 : index
    %c0_35 = arith.constant 0 : index
    %20 = vector.load %arg7[%c0_33, %c0_34, %c0_35] : memref<10x10x4xf32, #tpu.memory_space<vmem>>, vector<10x10x4xf32>
    %21 = vector.extract_strided_slice %20 {offsets = [0, 0, 0], sizes = [8, 8, 4], strides = [1, 1, 1]} : vector<10x10x4xf32> to vector<8x8x4xf32>
    %22 = vector.extract_strided_slice %20 {offsets = [0, 1, 0], sizes = [8, 8, 4], strides = [1, 1, 1]} : vector<10x10x4xf32> to vector<8x8x4xf32>
    %23 = vector.extract_strided_slice %20 {offsets = [0, 2, 0], sizes = [8, 8, 4], strides = [1, 1, 1]} : vector<10x10x4xf32> to vector<8x8x4xf32>
    %24 = vector.extract_strided_slice %20 {offsets = [1, 0, 0], sizes = [8, 8, 4], strides = [1, 1, 1]} : vector<10x10x4xf32> to vector<8x8x4xf32>
    %25 = vector.extract_strided_slice %20 {offsets = [1, 1, 0], sizes = [8, 8, 4], strides = [1, 1, 1]} : vector<10x10x4xf32> to vector<8x8x4xf32>
    %26 = vector.extract_strided_slice %20 {offsets = [1, 2, 0], sizes = [8, 8, 4], strides = [1, 1, 1]} : vector<10x10x4xf32> to vector<8x8x4xf32>
    %27 = vector.extract_strided_slice %20 {offsets = [2, 0, 0], sizes = [8, 8, 4], strides = [1, 1, 1]} : vector<10x10x4xf32> to vector<8x8x4xf32>
    %28 = vector.extract_strided_slice %20 {offsets = [2, 1, 0], sizes = [8, 8, 4], strides = [1, 1, 1]} : vector<10x10x4xf32> to vector<8x8x4xf32>
    %29 = vector.extract_strided_slice %20 {offsets = [2, 2, 0], sizes = [8, 8, 4], strides = [1, 1, 1]} : vector<10x10x4xf32> to vector<8x8x4xf32>
    %30 = vector.shape_cast %21 : vector<8x8x4xf32> to vector<64x4xf32>
    %c0_36 = arith.constant 0 : index
    %c0_37 = arith.constant 0 : index
    %c0_38 = arith.constant 0 : index
    %31 = vector.load %arg2[%c0_36, %c0_37, %c0_38] : memref<9x4x8xf32, #tpu.memory_space<vmem>>, vector<1x4x8xf32>
    %32 = vector.shape_cast %31 : vector<1x4x8xf32> to vector<4x8xf32>
    %cst_39 = arith.constant dense<0.000000e+00> : vector<64x8xf32>
    %33 = tpu.matmul %30, %32, %cst_39 {dimension_numbers = #tpu.dot_dimension_numbers<[1], [0], [0], [1], [0, 0, 1, 1], [], []>} : vector<64x4xf32>, vector<4x8xf32>, vector<64x8xf32> -> vector<64x8xf32>
    %34 = vector.shape_cast %22 : vector<8x8x4xf32> to vector<64x4xf32>
    %c1_40 = arith.constant 1 : index
    %c0_41 = arith.constant 0 : index
    %c0_42 = arith.constant 0 : index
    %35 = vector.load %arg2[%c1_40, %c0_41, %c0_42] : memref<9x4x8xf32, #tpu.memory_space<vmem>>, vector<1x4x8xf32>
    %36 = vector.shape_cast %35 : vector<1x4x8xf32> to vector<4x8xf32>
    %cst_43 = arith.constant dense<0.000000e+00> : vector<64x8xf32>
    %37 = tpu.matmul %34, %36, %cst_43 {dimension_numbers = #tpu.dot_dimension_numbers<[1], [0], [0], [1], [0, 0, 1, 1], [], []>} : vector<64x4xf32>, vector<4x8xf32>, vector<64x8xf32> -> vector<64x8xf32>
    %38 = arith.addf %33, %37 : vector<64x8xf32>
    %39 = vector.shape_cast %23 : vector<8x8x4xf32> to vector<64x4xf32>
    %c2_44 = arith.constant 2 : index
    %c0_45 = arith.constant 0 : index
    %c0_46 = arith.constant 0 : index
    %40 = vector.load %arg2[%c2_44, %c0_45, %c0_46] : memref<9x4x8xf32, #tpu.memory_space<vmem>>, vector<1x4x8xf32>
    %41 = vector.shape_cast %40 : vector<1x4x8xf32> to vector<4x8xf32>
    %cst_47 = arith.constant dense<0.000000e+00> : vector<64x8xf32>
    %42 = tpu.matmul %39, %41, %cst_47 {dimension_numbers = #tpu.dot_dimension_numbers<[1], [0], [0], [1], [0, 0, 1, 1], [], []>} : vector<64x4xf32>, vector<4x8xf32>, vector<64x8xf32> -> vector<64x8xf32>
    %43 = arith.addf %38, %42 : vector<64x8xf32>
    %44 = vector.shape_cast %24 : vector<8x8x4xf32> to vector<64x4xf32>
    %c3_48 = arith.constant 3 : index
    %c0_49 = arith.constant 0 : index
    %c0_50 = arith.constant 0 : index
    %45 = vector.load %arg2[%c3_48, %c0_49, %c0_50] : memref<9x4x8xf32, #tpu.memory_space<vmem>>, vector<1x4x8xf32>
    %46 = vector.shape_cast %45 : vector<1x4x8xf32> to vector<4x8xf32>
    %cst_51 = arith.constant dense<0.000000e+00> : vector<64x8xf32>
    %47 = tpu.matmul %44, %46, %cst_51 {dimension_numbers = #tpu.dot_dimension_numbers<[1], [0], [0], [1], [0, 0, 1, 1], [], []>} : vector<64x4xf32>, vector<4x8xf32>, vector<64x8xf32> -> vector<64x8xf32>
    %48 = arith.addf %43, %47 : vector<64x8xf32>
    %49 = vector.shape_cast %25 : vector<8x8x4xf32> to vector<64x4xf32>
    %c4 = arith.constant 4 : index
    %c0_52 = arith.constant 0 : index
    %c0_53 = arith.constant 0 : index
    %50 = vector.load %arg2[%c4, %c0_52, %c0_53] : memref<9x4x8xf32, #tpu.memory_space<vmem>>, vector<1x4x8xf32>
    %51 = vector.shape_cast %50 : vector<1x4x8xf32> to vector<4x8xf32>
    %cst_54 = arith.constant dense<0.000000e+00> : vector<64x8xf32>
    %52 = tpu.matmul %49, %51, %cst_54 {dimension_numbers = #tpu.dot_dimension_numbers<[1], [0], [0], [1], [0, 0, 1, 1], [], []>} : vector<64x4xf32>, vector<4x8xf32>, vector<64x8xf32> -> vector<64x8xf32>
    %53 = arith.addf %48, %52 : vector<64x8xf32>
    %54 = vector.shape_cast %26 : vector<8x8x4xf32> to vector<64x4xf32>
    %c5 = arith.constant 5 : index
    %c0_55 = arith.constant 0 : index
    %c0_56 = arith.constant 0 : index
    %55 = vector.load %arg2[%c5, %c0_55, %c0_56] : memref<9x4x8xf32, #tpu.memory_space<vmem>>, vector<1x4x8xf32>
    %56 = vector.shape_cast %55 : vector<1x4x8xf32> to vector<4x8xf32>
    %cst_57 = arith.constant dense<0.000000e+00> : vector<64x8xf32>
    %57 = tpu.matmul %54, %56, %cst_57 {dimension_numbers = #tpu.dot_dimension_numbers<[1], [0], [0], [1], [0, 0, 1, 1], [], []>} : vector<64x4xf32>, vector<4x8xf32>, vector<64x8xf32> -> vector<64x8xf32>
    %58 = arith.addf %53, %57 : vector<64x8xf32>
    %59 = vector.shape_cast %27 : vector<8x8x4xf32> to vector<64x4xf32>
    %c6 = arith.constant 6 : index
    %c0_58 = arith.constant 0 : index
    %c0_59 = arith.constant 0 : index
    %60 = vector.load %arg2[%c6, %c0_58, %c0_59] : memref<9x4x8xf32, #tpu.memory_space<vmem>>, vector<1x4x8xf32>
    %61 = vector.shape_cast %60 : vector<1x4x8xf32> to vector<4x8xf32>
    %cst_60 = arith.constant dense<0.000000e+00> : vector<64x8xf32>
    %62 = tpu.matmul %59, %61, %cst_60 {dimension_numbers = #tpu.dot_dimension_numbers<[1], [0], [0], [1], [0, 0, 1, 1], [], []>} : vector<64x4xf32>, vector<4x8xf32>, vector<64x8xf32> -> vector<64x8xf32>
    %63 = arith.addf %58, %62 : vector<64x8xf32>
    %64 = vector.shape_cast %28 : vector<8x8x4xf32> to vector<64x4xf32>
    %c7 = arith.constant 7 : index
    %c0_61 = arith.constant 0 : index
    %c0_62 = arith.constant 0 : index
    %65 = vector.load %arg2[%c7, %c0_61, %c0_62] : memref<9x4x8xf32, #tpu.memory_space<vmem>>, vector<1x4x8xf32>
    %66 = vector.shape_cast %65 : vector<1x4x8xf32> to vector<4x8xf32>
    %cst_63 = arith.constant dense<0.000000e+00> : vector<64x8xf32>
    %67 = tpu.matmul %64, %66, %cst_63 {dimension_numbers = #tpu.dot_dimension_numbers<[1], [0], [0], [1], [0, 0, 1, 1], [], []>} : vector<64x4xf32>, vector<4x8xf32>, vector<64x8xf32> -> vector<64x8xf32>
    %68 = arith.addf %63, %67 : vector<64x8xf32>
    %69 = vector.shape_cast %29 : vector<8x8x4xf32> to vector<64x4xf32>
    %c8 = arith.constant 8 : index
    %c0_64 = arith.constant 0 : index
    %c0_65 = arith.constant 0 : index
    %70 = vector.load %arg2[%c8, %c0_64, %c0_65] : memref<9x4x8xf32, #tpu.memory_space<vmem>>, vector<1x4x8xf32>
    %71 = vector.shape_cast %70 : vector<1x4x8xf32> to vector<4x8xf32>
    %cst_66 = arith.constant dense<0.000000e+00> : vector<64x8xf32>
    %72 = tpu.matmul %69, %71, %cst_66 {dimension_numbers = #tpu.dot_dimension_numbers<[1], [0], [0], [1], [0, 0, 1, 1], [], []>} : vector<64x4xf32>, vector<4x8xf32>, vector<64x8xf32> -> vector<64x8xf32>
    %73 = arith.addf %68, %72 : vector<64x8xf32>
    %c0_67 = arith.constant 0 : index
    %c0_68 = arith.constant 0 : index
    %74 = vector.load %arg3[%c0_67, %c0_68] : memref<1x8xf32, #tpu.memory_space<vmem>>, vector<1x8xf32>
    %75 = vector.broadcast %74 : vector<1x8xf32> to vector<64x8xf32>
    %76 = arith.addf %73, %75 : vector<64x8xf32>
    %cst_69 = arith.constant 0.000000e+00 : f32
    %77 = vector.broadcast %cst_69 : f32 to vector<64x8xf32>
    %78 = arith.maximumf %76, %77 : vector<64x8xf32>
    %cst_70 = arith.constant 0.000000e+00 : f32
    %79 = vector.broadcast %cst_70 : f32 to vector<1x10x8xf32>
    %c0_71 = arith.constant 0 : index
    %c0_72 = arith.constant 0 : index
    %c0_73 = arith.constant 0 : index
    %80 = vector.load %arg8[%c0_71, %c0_72, %c0_73] : memref<10x10x8xf32, #tpu.memory_space<vmem>>, vector<1x10x8xf32>
    tpu.vector_store %arg8[%c0_71, %c0_72, %c0_73], %79 {strides = array<i32>} : memref<10x10x8xf32, #tpu.memory_space<vmem>>, vector<1x10x8xf32>,
    %cst_74 = arith.constant 0.000000e+00 : f32
    %81 = vector.broadcast %cst_74 : f32 to vector<1x10x8xf32>
    %c9_75 = arith.constant 9 : index
    %c0_76 = arith.constant 0 : index
    %c0_77 = arith.constant 0 : index
    %82 = vector.load %arg8[%c9_75, %c0_76, %c0_77] : memref<10x10x8xf32, #tpu.memory_space<vmem>>, vector<1x10x8xf32>
    tpu.vector_store %arg8[%c9_75, %c0_76, %c0_77], %81 {strides = array<i32>} : memref<10x10x8xf32, #tpu.memory_space<vmem>>, vector<1x10x8xf32>,
    %cst_78 = arith.constant 0.000000e+00 : f32
    %83 = vector.broadcast %cst_78 : f32 to vector<10x1x8xf32>
    %c0_79 = arith.constant 0 : index
    %c0_80 = arith.constant 0 : index
    %c0_81 = arith.constant 0 : index
    %84 = vector.load %arg8[%c0_79, %c0_80, %c0_81] : memref<10x10x8xf32, #tpu.memory_space<vmem>>, vector<10x1x8xf32>
    tpu.vector_store %arg8[%c0_79, %c0_80, %c0_81], %83 {strides = array<i32>} : memref<10x10x8xf32, #tpu.memory_space<vmem>>, vector<10x1x8xf32>,
    %cst_82 = arith.constant 0.000000e+00 : f32
    %85 = vector.broadcast %cst_82 : f32 to vector<10x1x8xf32>
    %c0_83 = arith.constant 0 : index
    %c9_84 = arith.constant 9 : index
    %c0_85 = arith.constant 0 : index
    %86 = vector.load %arg8[%c0_83, %c9_84, %c0_85] : memref<10x10x8xf32, #tpu.memory_space<vmem>>, vector<10x1x8xf32>
    tpu.vector_store %arg8[%c0_83, %c9_84, %c0_85], %85 {strides = array<i32>} : memref<10x10x8xf32, #tpu.memory_space<vmem>>, vector<10x1x8xf32>,
    %87 = vector.shape_cast %78 : vector<64x8xf32> to vector<8x8x8xf32>
    %c1_86 = arith.constant 1 : index
    %c1_87 = arith.constant 1 : index
    %c0_88 = arith.constant 0 : index
    %88 = vector.load %arg8[%c1_86, %c1_87, %c0_88] : memref<10x10x8xf32, #tpu.memory_space<vmem>>, vector<8x8x8xf32>
    tpu.vector_store %arg8[%c1_86, %c1_87, %c0_88], %87 {strides = array<i32>} : memref<10x10x8xf32, #tpu.memory_space<vmem>>, vector<8x8x8xf32>,
    %c0_89 = arith.constant 0 : index
    %c0_90 = arith.constant 0 : index
    %c0_91 = arith.constant 0 : index
    %89 = vector.load %arg8[%c0_89, %c0_90, %c0_91] : memref<10x10x8xf32, #tpu.memory_space<vmem>>, vector<10x10x8xf32>
    %90 = vector.extract_strided_slice %89 {offsets = [0, 0, 0], sizes = [8, 8, 8], strides = [1, 1, 1]} : vector<10x10x8xf32> to vector<8x8x8xf32>
    %91 = vector.extract_strided_slice %89 {offsets = [0, 1, 0], sizes = [8, 8, 8], strides = [1, 1, 1]} : vector<10x10x8xf32> to vector<8x8x8xf32>
    %92 = vector.extract_strided_slice %89 {offsets = [0, 2, 0], sizes = [8, 8, 8], strides = [1, 1, 1]} : vector<10x10x8xf32> to vector<8x8x8xf32>
    %93 = vector.extract_strided_slice %89 {offsets = [1, 0, 0], sizes = [8, 8, 8], strides = [1, 1, 1]} : vector<10x10x8xf32> to vector<8x8x8xf32>
    %94 = vector.extract_strided_slice %89 {offsets = [1, 1, 0], sizes = [8, 8, 8], strides = [1, 1, 1]} : vector<10x10x8xf32> to vector<8x8x8xf32>
    %95 = vector.extract_strided_slice %89 {offsets = [1, 2, 0], sizes = [8, 8, 8], strides = [1, 1, 1]} : vector<10x10x8xf32> to vector<8x8x8xf32>
    %96 = vector.extract_strided_slice %89 {offsets = [2, 0, 0], sizes = [8, 8, 8], strides = [1, 1, 1]} : vector<10x10x8xf32> to vector<8x8x8xf32>
    %97 = vector.extract_strided_slice %89 {offsets = [2, 1, 0], sizes = [8, 8, 8], strides = [1, 1, 1]} : vector<10x10x8xf32> to vector<8x8x8xf32>
    %98 = vector.extract_strided_slice %89 {offsets = [2, 2, 0], sizes = [8, 8, 8], strides = [1, 1, 1]} : vector<10x10x8xf32> to vector<8x8x8xf32>
    %99 = vector.shape_cast %90 : vector<8x8x8xf32> to vector<64x8xf32>
    %c0_92 = arith.constant 0 : index
    %c0_93 = arith.constant 0 : index
    %c0_94 = arith.constant 0 : index
    %100 = vector.load %arg4[%c0_92, %c0_93, %c0_94] : memref<9x8x8xf32, #tpu.memory_space<vmem>>, vector<1x8x8xf32>
    %101 = vector.shape_cast %100 : vector<1x8x8xf32> to vector<8x8xf32>
    %cst_95 = arith.constant dense<0.000000e+00> : vector<64x8xf32>
    %102 = tpu.matmul %99, %101, %cst_95 {dimension_numbers = #tpu.dot_dimension_numbers<[1], [0], [0], [1], [0, 0, 1, 1], [], []>} : vector<64x8xf32>, vector<8x8xf32>, vector<64x8xf32> -> vector<64x8xf32>
    %103 = vector.shape_cast %91 : vector<8x8x8xf32> to vector<64x8xf32>
    %c1_96 = arith.constant 1 : index
    %c0_97 = arith.constant 0 : index
    %c0_98 = arith.constant 0 : index
    %104 = vector.load %arg4[%c1_96, %c0_97, %c0_98] : memref<9x8x8xf32, #tpu.memory_space<vmem>>, vector<1x8x8xf32>
    %105 = vector.shape_cast %104 : vector<1x8x8xf32> to vector<8x8xf32>
    %cst_99 = arith.constant dense<0.000000e+00> : vector<64x8xf32>
    %106 = tpu.matmul %103, %105, %cst_99 {dimension_numbers = #tpu.dot_dimension_numbers<[1], [0], [0], [1], [0, 0, 1, 1], [], []>} : vector<64x8xf32>, vector<8x8xf32>, vector<64x8xf32> -> vector<64x8xf32>
    %107 = arith.addf %102, %106 : vector<64x8xf32>
    %108 = vector.shape_cast %92 : vector<8x8x8xf32> to vector<64x8xf32>
    %c2_100 = arith.constant 2 : index
    %c0_101 = arith.constant 0 : index
    %c0_102 = arith.constant 0 : index
    %109 = vector.load %arg4[%c2_100, %c0_101, %c0_102] : memref<9x8x8xf32, #tpu.memory_space<vmem>>, vector<1x8x8xf32>
    %110 = vector.shape_cast %109 : vector<1x8x8xf32> to vector<8x8xf32>
    %cst_103 = arith.constant dense<0.000000e+00> : vector<64x8xf32>
    %111 = tpu.matmul %108, %110, %cst_103 {dimension_numbers = #tpu.dot_dimension_numbers<[1], [0], [0], [1], [0, 0, 1, 1], [], []>} : vector<64x8xf32>, vector<8x8xf32>, vector<64x8xf32> -> vector<64x8xf32>
    %112 = arith.addf %107, %111 : vector<64x8xf32>
    %113 = vector.shape_cast %93 : vector<8x8x8xf32> to vector<64x8xf32>
    %c3_104 = arith.constant 3 : index
    %c0_105 = arith.constant 0 : index
    %c0_106 = arith.constant 0 : index
    %114 = vector.load %arg4[%c3_104, %c0_105, %c0_106] : memref<9x8x8xf32, #tpu.memory_space<vmem>>, vector<1x8x8xf32>
    %115 = vector.shape_cast %114 : vector<1x8x8xf32> to vector<8x8xf32>
    %cst_107 = arith.constant dense<0.000000e+00> : vector<64x8xf32>
    %116 = tpu.matmul %113, %115, %cst_107 {dimension_numbers = #tpu.dot_dimension_numbers<[1], [0], [0], [1], [0, 0, 1, 1], [], []>} : vector<64x8xf32>, vector<8x8xf32>, vector<64x8xf32> -> vector<64x8xf32>
    %117 = arith.addf %112, %116 : vector<64x8xf32>
    %118 = vector.shape_cast %94 : vector<8x8x8xf32> to vector<64x8xf32>
    %c4_108 = arith.constant 4 : index
    %c0_109 = arith.constant 0 : index
    %c0_110 = arith.constant 0 : index
    %119 = vector.load %arg4[%c4_108, %c0_109, %c0_110] : memref<9x8x8xf32, #tpu.memory_space<vmem>>, vector<1x8x8xf32>
    %120 = vector.shape_cast %119 : vector<1x8x8xf32> to vector<8x8xf32>
    %cst_111 = arith.constant dense<0.000000e+00> : vector<64x8xf32>
    %121 = tpu.matmul %118, %120, %cst_111 {dimension_numbers = #tpu.dot_dimension_numbers<[1], [0], [0], [1], [0, 0, 1, 1], [], []>} : vector<64x8xf32>, vector<8x8xf32>, vector<64x8xf32> -> vector<64x8xf32>
    %122 = arith.addf %117, %121 : vector<64x8xf32>
    %123 = vector.shape_cast %95 : vector<8x8x8xf32> to vector<64x8xf32>
    %c5_112 = arith.constant 5 : index
    %c0_113 = arith.constant 0 : index
    %c0_114 = arith.constant 0 : index
    %124 = vector.load %arg4[%c5_112, %c0_113, %c0_114] : memref<9x8x8xf32, #tpu.memory_space<vmem>>, vector<1x8x8xf32>
    %125 = vector.shape_cast %124 : vector<1x8x8xf32> to vector<8x8xf32>
    %cst_115 = arith.constant dense<0.000000e+00> : vector<64x8xf32>
    %126 = tpu.matmul %123, %125, %cst_115 {dimension_numbers = #tpu.dot_dimension_numbers<[1], [0], [0], [1], [0, 0, 1, 1], [], []>} : vector<64x8xf32>, vector<8x8xf32>, vector<64x8xf32> -> vector<64x8xf32>
    %127 = arith.addf %122, %126 : vector<64x8xf32>
    %128 = vector.shape_cast %96 : vector<8x8x8xf32> to vector<64x8xf32>
    %c6_116 = arith.constant 6 : index
    %c0_117 = arith.constant 0 : index
    %c0_118 = arith.constant 0 : index
    %129 = vector.load %arg4[%c6_116, %c0_117, %c0_118] : memref<9x8x8xf32, #tpu.memory_space<vmem>>, vector<1x8x8xf32>
    %130 = vector.shape_cast %129 : vector<1x8x8xf32> to vector<8x8xf32>
    %cst_119 = arith.constant dense<0.000000e+00> : vector<64x8xf32>
    %131 = tpu.matmul %128, %130, %cst_119 {dimension_numbers = #tpu.dot_dimension_numbers<[1], [0], [0], [1], [0, 0, 1, 1], [], []>} : vector<64x8xf32>, vector<8x8xf32>, vector<64x8xf32> -> vector<64x8xf32>
    %132 = arith.addf %127, %131 : vector<64x8xf32>
    %133 = vector.shape_cast %97 : vector<8x8x8xf32> to vector<64x8xf32>
    %c7_120 = arith.constant 7 : index
    %c0_121 = arith.constant 0 : index
    %c0_122 = arith.constant 0 : index
    %134 = vector.load %arg4[%c7_120, %c0_121, %c0_122] : memref<9x8x8xf32, #tpu.memory_space<vmem>>, vector<1x8x8xf32>
    %135 = vector.shape_cast %134 : vector<1x8x8xf32> to vector<8x8xf32>
    %cst_123 = arith.constant dense<0.000000e+00> : vector<64x8xf32>
    %136 = tpu.matmul %133, %135, %cst_123 {dimension_numbers = #tpu.dot_dimension_numbers<[1], [0], [0], [1], [0, 0, 1, 1], [], []>} : vector<64x8xf32>, vector<8x8xf32>, vector<64x8xf32> -> vector<64x8xf32>
    %137 = arith.addf %132, %136 : vector<64x8xf32>
    %138 = vector.shape_cast %98 : vector<8x8x8xf32> to vector<64x8xf32>
    %c8_124 = arith.constant 8 : index
    %c0_125 = arith.constant 0 : index
    %c0_126 = arith.constant 0 : index
    %139 = vector.load %arg4[%c8_124, %c0_125, %c0_126] : memref<9x8x8xf32, #tpu.memory_space<vmem>>, vector<1x8x8xf32>
    %140 = vector.shape_cast %139 : vector<1x8x8xf32> to vector<8x8xf32>
    %cst_127 = arith.constant dense<0.000000e+00> : vector<64x8xf32>
    %141 = tpu.matmul %138, %140, %cst_127 {dimension_numbers = #tpu.dot_dimension_numbers<[1], [0], [0], [1], [0, 0, 1, 1], [], []>} : vector<64x8xf32>, vector<8x8xf32>, vector<64x8xf32> -> vector<64x8xf32>
    %142 = arith.addf %137, %141 : vector<64x8xf32>
    %c0_128 = arith.constant 0 : index
    %c0_129 = arith.constant 0 : index
    %143 = vector.load %arg5[%c0_128, %c0_129] : memref<1x8xf32, #tpu.memory_space<vmem>>, vector<1x8xf32>
    %144 = vector.broadcast %143 : vector<1x8xf32> to vector<64x8xf32>
    %145 = arith.addf %142, %144 : vector<64x8xf32>
    %cst_130 = arith.constant 0.000000e+00 : f32
    %146 = vector.broadcast %cst_130 : f32 to vector<64x8xf32>
    %147 = arith.maximumf %145, %146 : vector<64x8xf32>
    %148 = vector.shape_cast %147 : vector<64x8xf32> to vector<8x8x8xf32>
    %c0_131 = arith.constant 0 : index
    %c0_132 = arith.constant 0 : index
    %c0_133 = arith.constant 0 : index
    %c0_134 = arith.constant 0 : index
    %149 = vector.load %arg6[%c0_131, %c0_132, %c0_133, %c0_134] : memref<1x8x8x8xf32, #tpu.memory_space<vmem>>, vector<1x8x8x8xf32>
    %150 = vector.shape_cast %149 : vector<1x8x8x8xf32> to vector<8x8x8xf32>
    %151 = vector.shape_cast %148 : vector<8x8x8xf32> to vector<1x8x8x8xf32>
    tpu.vector_store %arg6[%c0_131, %c0_132, %c0_133, %c0_134], %151 {strides = array<i32>} : memref<1x8x8x8xf32, #tpu.memory_space<vmem>>, vector<1x8x8x8xf32>,
    return
  }
  func.func @transform_0(%arg0: i32) -> (i32, i32, i32, i32, i32) {
    %c0_i32 = arith.constant 0 : i32
    %c0_i32_0 = arith.constant 0 : i32
    %c0_i32_1 = arith.constant 0 : i32
    %c0_i32_2 = arith.constant 0 : i32
    %c0_i32_3 = arith.constant 0 : i32
    return %arg0, %c0_i32, %c0_i32_0, %c0_i32_1, %c0_i32_2 : i32, i32, i32, i32, i32
  }
  func.func @transform_1(%arg0: i32) -> (i32, i32, i32) {
    %c0_i32 = arith.constant 0 : i32
    %c0_i32_0 = arith.constant 0 : i32
    %c0_i32_1 = arith.constant 0 : i32
    %c0_i32_2 = arith.constant 0 : i32
    return %c0_i32, %c0_i32_0, %c0_i32_1 : i32, i32, i32
  }
  func.func @transform_2(%arg0: i32) -> (i32, i32) {
    %c0_i32 = arith.constant 0 : i32
    %c0_i32_0 = arith.constant 0 : i32
    %c0_i32_1 = arith.constant 0 : i32
    return %c0_i32, %c0_i32_0 : i32, i32
  }
  func.func @transform_3(%arg0: i32) -> (i32, i32, i32) {
    %c0_i32 = arith.constant 0 : i32
    %c0_i32_0 = arith.constant 0 : i32
    %c0_i32_1 = arith.constant 0 : i32
    %c0_i32_2 = arith.constant 0 : i32
    return %c0_i32, %c0_i32_0, %c0_i32_1 : i32, i32, i32
  }
  func.func @transform_4(%arg0: i32) -> (i32, i32) {
    %c0_i32 = arith.constant 0 : i32
    %c0_i32_0 = arith.constant 0 : i32
    %c0_i32_1 = arith.constant 0 : i32
    return %c0_i32, %c0_i32_0 : i32, i32
  }
  func.func @transform_5(%arg0: i32) -> (i32, i32, i32, i32) {
    %c0_i32 = arith.constant 0 : i32
    %c0_i32_0 = arith.constant 0 : i32
    %c0_i32_1 = arith.constant 0 : i32
    %c0_i32_2 = arith.constant 0 : i32
    return %arg0, %c0_i32, %c0_i32_0, %c0_i32_1 : i32, i32, i32, i32
  }
}

</mosaic_0001>

<bundles_post_ra>
// kernel: tpu_custom_call.1
= control target key start
LH: loop header
LB: loop body
LE: loop exit
PB: predicated region body
PF: predicated region fallthrough
CT: control target
= control target key end

     0   :  { %10 = vsyncpa [#allocation5], 0  ;;  %s4566_s0 = inlined_call_operand.vmem [shape: f32[2,4,8,8,4], index: 0, kind: input, shape index: {}]   ;;  %s4567_s1 = inlined_call_operand.vmem [shape: f32[9,4,8], index: 1, kind: input, shape index: {}]   ;;  %s4568_s2 = inlined_call_operand.vmem [shape: f32[1,8], index: 2, kind: input, shape index: {}]   ;;  %s4569_s3 = inlined_call_operand.vmem [shape: f32[9,8,8], index: 3, kind: input, shape index: {}]   ;;  %s4570_s4 = inlined_call_operand.vmem [shape: f32[1,8], index: 4, kind: input, shape index: {}]   ;;  %s4571_s5 = inlined_call_operand.hbm [shape: f32[2,8,8,8], index: 5, kind: output, shape index: {}]  }
   0x1   :  { %12 = vsyncpa [#allocation5 + $0x1], 0  ;;  %s3763_s18 = smov 0   ;;  %s3765_s19 = smov 0  }
   0x2   :  { %s3767_s20 = smov 0   ;;  %s3769_s21 = smov 0  }
   0x3 LB: > { %s3784_s22 = sadd.s32 4294967295, %s3727_s21   ;;  %s2872_s23 = sadd.s32 4294967294, %s3727_s21   ;;  %s3727_s21 = sphi %s3769_s21, %s4577_s21   ;;  %s3723_s20 = sphi %s3767_s20, %s4576_s20   ;;  %s3719_s19 = sphi %s3765_s19, %s4575_s19   ;;  %s3715_s18 = sphi %s3763_s18, %s4574_s18  }
   0x4   : > { %s3788_s24 = sadd.s32 1, %s3727_s21   ;;  %s135_s25 = sadd.s32 1, %s3723_s20 }
   0x5   : > { %s132_s26 = ssub.s32 %s3727_s21, %s3788_s24  ;;  %p145_p0 = scmp.ne.s32.totalorder %s3723_s20, %s3719_s19 }
   0x6   : > { %p133_p1 = scmp.eq.s32.totalorder %s132_s26, 0  ;;  %p146_p2 = scmp.eq.s32.totalorder %s3784_s22, 1 }
   0x7   : > { %p151_p3 = scmp.ne.s32.totalorder %s3719_s19, %s3715_s18  ;;  %p152_p4 = scmp.eq.s32.totalorder %s2872_s23, 1 }
   0x8   : > { %s3799_s27 = scalar_select %p133_p1, %s3723_s20, %s135_s25  }
   0x9   : > { %p3801_p5 = por %p146_p2, %p145_p0  ;;  %p3805_p6 = por %p152_p4, %p151_p3 }
   0xa   : > { %p2875_p7 = scmp.ge.s32.totalorder %s3727_s21, 1  ;;  %p190_p8 = scmp.lt.s32.totalorder %s3727_s21, 3 }
   0xc   : > { %p191_p9 = pnand %p2875_p7, %p190_p8 }
   0xd   : > { %v2903_v0 = vld [vmem:[%s4567_s1 + $0x4] sm:$0xf] (!%p191_p9)  ;;  %vm399_vm0 = vcmask (!%p191_p9), 1043456   ;;  %vm282_vm1 = vcmask (!%p191_p9), 31744   ;;  %vm284_vm2 = vcmask (!%p191_p9), 25600   ;;  %v3729_v1 = vmov (!%p191_p9), 0.0  }
   0xe   : > { %194 = sbr.rel (%p191_p9) target bundleno = 772 (0x304), region = 40  ;;  %3243 = vmatprep.subr.msk.mxu0 (!%p191_p9), %vm399_vm0, %v2903_v0  ;;  %283 = vst.msk [vmem:[#allocation2] sm:$0xff] (!%p191_p9), %vm282_vm1, %v3729_v1  ;;  %vm289_vm3 = vcmask (!%p191_p9), 24576   ;;  %287 = vst.msk [vmem:[#allocation2 + $0x90] sm:$0xff] (!%p191_p9), %vm282_vm1, %v3729_v1  ;;  %v3824_v2 = vld [vmem:[%s4567_s1] sm:$0xf] (!%p191_p9) }
   0xf   : > { %285 = vst.msk [vmem:[#allocation2 + $0x8] sm:$0x3] (!%p191_p9), %vm284_vm2, %v3729_v1  ;;  %288 = vst.msk [vmem:[#allocation2 + $0x98] sm:$0x3] (!%p191_p9), %vm284_vm2, %v3729_v1  ;;  %p218_p10 = scmp.lt.s32.totalorder (!%p191_p9), %s3784_s22, 1  ;;  %3244 = vmatpush3.msk.msra.mxu0 (!%p191_p9), %vm399_vm0, %v2903_v0  ;;  %vm356_vm4 = vcmask (!%p191_p9), 1046528  }
  0x10   : > { %290 = vst.msk [vmem:[#allocation2] sm:$0x1] (!%p191_p9), %vm289_vm3, %v3729_v1  ;;  %300 = vst.msk [vmem:[#allocation2 + $0x9] sm:$0x1] (!%p191_p9), %vm289_vm3, %v3729_v1  ;;  %3257 = vmatprep.subr.msk.mxu0 (!%p191_p9), %vm399_vm0, %v3824_v2  ;;  %vm632_vm5 = vcmask (!%p191_p9), 1045504   ;;  %vm1550_vm6 = vcmask (!%p191_p9), 64512  }
  0x11   : > { %291 = vst.msk [vmem:[#allocation2 + $0x10] sm:$0x1] (!%p191_p9), %vm289_vm3, %v3729_v1  ;;  %292 = vst.msk [vmem:[#allocation2 + $0x20] sm:$0x1] (!%p191_p9), %vm289_vm3, %v3729_v1  ;;  %vm1552_vm7 = vcmask (!%p191_p9), 58368   ;;  %vm1557_vm8 = vcmask (!%p191_p9), 57344  }
  0x12   : > { %293 = vst.msk [vmem:[#allocation2 + $0x30] sm:$0x1] (!%p191_p9), %vm289_vm3, %v3729_v1  ;;  %294 = vst.msk [vmem:[#allocation2 + $0x40] sm:$0x1] (!%p191_p9), %vm289_vm3, %v3729_v1  ;;  %s215_s16 = sand.u32 (!%p191_p9), 1, %s3719_s19   ;;  %s3080_s30 = sshll.u32 (!%p191_p9), %s3784_s22, 10 }
  0x13   : > { %295 = vst.msk [vmem:[#allocation2 + $0x50] sm:$0x1] (!%p191_p9), %vm289_vm3, %v3729_v1  ;;  %296 = vst.msk [vmem:[#allocation2 + $0x60] sm:$0x1] (!%p191_p9), %vm289_vm3, %v3729_v1  ;;  %s2876_s25 = sshll.u32 (!%p191_p9), %s215_s16, 6  ;;  %s3730_s11 = smov (!%p191_p9), [#allocation4]  }
  0x14   : > { %297 = vst.msk [vmem:[#allocation2 + $0x70] sm:$0x1] (!%p191_p9), %vm289_vm3, %v3729_v1  ;;  %298 = vst.msk [vmem:[#allocation2 + $0x80] sm:$0x1] (!%p191_p9), %vm289_vm3, %v3729_v1  ;;  %s217_s26 = scalar_lea.vmem (!%p191_p9), [#allocation4], %s2876_s25  ;;  %s3669_s12 = sshll.u32 (!%p191_p9), %s3730_s11, 4  ;;  %s3670_s12 = int_to_ptr.vmem [resolvable:$false] %s3669_s12 }
  0x15   : > { %301 = vst.msk [vmem:[#allocation2 + $0x19] sm:$0x1] %vm289_vm3, %v3729_v1  ;;  %302 = vst.msk [vmem:[#allocation2 + $0x29] sm:$0x1] %vm289_vm3, %v3729_v1  ;;  %s219_s9 = scalar_select %p218_p10, %s3784_s22, 1 }
  0x16   : > { %303 = vst.msk [vmem:[#allocation2 + $0x39] sm:$0x1] %vm289_vm3, %v3729_v1  ;;  %304 = vst.msk [vmem:[#allocation2 + $0x49] sm:$0x1] %vm289_vm3, %v3729_v1  ;;  %s2810_s6 = sshll.u32 %s217_s26, 4  ;;  %s4525_s22 = scalar_lea.sflag [#allocation5], %s215_s16  ;;  %s4519_s6 = int_to_ptr.vmem [resolvable:$true] %s2810_s6 }
  0x17   : > { %305 = vst.msk [vmem:[#allocation2 + $0x59] sm:$0x1] %vm289_vm3, %v3729_v1  ;;  %306 = vst.msk [vmem:[#allocation2 + $0x69] sm:$0x1] %vm289_vm3, %v3729_v1  ;;  %s3079_s10 = sshll.u32 %s219_s9, 8  ;;  %v3884_v10 = vld [vmem:[#allocation2] sm:$0xff]  ;;  %s4517_s9 = scalar_lea.hbm %s4571_s5, %s3080_s30 }
  0x18   : > { %307 = vst.msk [vmem:[#allocation2 + $0x79] sm:$0x1] %vm289_vm3, %v3729_v1  ;;  %308 = vst.msk [vmem:[#allocation2 + $0x89] sm:$0x1] %vm289_vm3, %v3729_v1  ;;  %s3876_s13 = scalar_lea.vmem %s4566_s0, %s3079_s10  ;;  %v3886_v11 = vld [vmem:[#allocation2 + $0x8] sm:$0x3]  ;;  %p3672_p0 = scmp.lt.s32.totalorder %s4519_s6, %s3670_s12 }
  0x19   : > { %309 = vst.msk [vmem:[#allocation2 + $0x99] sm:$0x1] %vm289_vm3, %v3729_v1  ;;  %299 = vst.msk [vmem:[#allocation2 + $0x90] sm:$0x1] %vm289_vm3, %v3729_v1  ;;  %v223_v3 = vld [vmem:[%s3876_s13] sm:$0xff]  ;;  %v224_v8 = vld [vmem:[%s3876_s13 + $0x8] sm:$0xff] }
  0x1a   : > { %v2879_v4 = vld [vmem:[%s3876_s13 + $0x40] sm:$0xff]  ;;  %v2880_v9 = vld [vmem:[%s3876_s13 + $0x48] sm:$0xff]  ;;  %v357_v15 = vrot.slane %v3884_v10, 1  ;;  %v358_v16 = vrot.slane %v3886_v11, 1  ;;  %v225_v18 = vld [vmem:[%s3876_s13 + $0x10] sm:$0xff]  ;;  %1551 = vst.msk [vmem:[#allocation3] sm:$0xff] %vm1550_vm6, %v3729_v1 }
  0x1b   : > { %v2887_v5 = vld [vmem:[%s3876_s13 + $0x80] sm:$0xff]  ;;  %v240_v6 = vmax.f32 %v223_v3, %v2879_v4  ;;  %v241_v13 = vmax.f32 %v224_v8, %v2880_v9  ;;  %v2888_v14 = vld [vmem:[%s3876_s13 + $0x88] sm:$0xff]  ;;  %v2881_v19 = vld [vmem:[%s3876_s13 + $0x50] sm:$0xff]  ;;  %1555 = vst.msk [vmem:[#allocation3 + $0x90] sm:$0xff] %vm1550_vm6, %v3729_v1  ;;  %s3665_s10 = scalar_lea.vmem %s4519_s6, 1024 }
  0x1c   : > { %v2895_v7 = vld [vmem:[%s3876_s13 + $0xc0] sm:$0xff]  ;;  %v2896_v17 = vld [vmem:[%s3876_s13 + $0xc8] sm:$0xff]  ;;  %v242_v22 = vmax.f32 %v225_v18, %v2881_v19  ;;  %v2889_v23 = vld [vmem:[%s3876_s13 + $0x90] sm:$0xff]  ;;  %v359_v26 = vsel %vm356_vm4, %v357_v15, %v358_v16  ;;  %1553 = vst.msk [vmem:[#allocation3 + $0x8] sm:$0x3] %vm1552_vm7, %v3729_v1  ;;  %p3666_p11 = scmp.ne.s32.totalorder %s4519_s6, %s3665_s10 }
  0x1d   : > { %v266_v12 = vmax.f32 %v2887_v5, %v2895_v7  ;;  %v267_v21 = vmax.f32 %v2888_v14, %v2896_v17  ;;  %v2897_v24 = vld [vmem:[%s3876_s13 + $0xd0] sm:$0xff]  ;;  %v226_v25 = vld [vmem:[%s3876_s13 + $0x18] sm:$0xff]  ;;  %3245 = vmatprep.mubr.msk.f32.mxu0 %vm282_vm1, %v359_v26  ;;  %v227_v34 = vld [vmem:[%s3876_s13 + $0x20] sm:$0xff]  ;;  %1556 = vst.msk [vmem:[#allocation3 + $0x98] sm:$0x3] %vm1552_vm7, %v3729_v1 }
  0x1e   : > { %v268_v27 = vmax.f32 %v2889_v23, %v2897_v24  ;;  %v2882_v28 = vld [vmem:[%s3876_s13 + $0x58] sm:$0xff]  ;;  %v2883_v35 = vld [vmem:[%s3876_s13 + $0x60] sm:$0xff]  ;;  %v228_v40 = vld [vmem:[%s3876_s13 + $0x28] sm:$0xff]  ;;  %1558 = vst.msk [vmem:[#allocation3] sm:$0x1] %vm1557_vm8, %v3729_v1  ;;  %p3667_p12 = pnand %p3666_p11, %p3801_p5 }
  0x1f   : > { %v274_v20 = vmax.f32 %v240_v6, %v266_v12  ;;  %v2890_v29 = vld [vmem:[%s3876_s13 + $0x98] sm:$0xff]  ;;  %v275_v31 = vmax.f32 %v241_v13, %v267_v21  ;;  %v243_v32 = vmax.f32 %v226_v25, %v2882_v28  ;;  %v2891_v36 = vld [vmem:[%s3876_s13 + $0xa0] sm:$0xff]  ;;  %v244_v38 = vmax.f32 %v227_v34, %v2883_v35  ;;  %v2884_v41 = vld [vmem:[%s3876_s13 + $0x68] sm:$0xff]  ;;  %1568 = vst.msk [vmem:[#allocation3 + $0x9] sm:$0x1] %vm1557_vm8, %v3729_v1 }
  0x20   : > { %v2898_v30 = vld [vmem:[%s3876_s13 + $0xd8] sm:$0xff]  ;;  %v276_v37 = vmax.f32 %v242_v22, %v268_v27  ;;  %v2899_v39 = vld [vmem:[%s3876_s13 + $0xe0] sm:$0xff]  ;;  %v245_v44 = vmax.f32 %v228_v40, %v2884_v41  ;;  %v2892_v45 = vld [vmem:[%s3876_s13 + $0xa8] sm:$0xff]  ;;  %v634_v40 = vrot.slane %v3886_v11, 2  ;;  %v633_v41 = vrot.slane %v3884_v10, 2  ;;  %p3668_p13 = pneg %p3667_p12 }
  0x21   : > { %311 = vst.msk [vmem:[#allocation2 + $0x11] sm:$0xff] %vm282_vm1, %v274_v20  ;;  %v269_v33 = vmax.f32 %v2890_v29, %v2898_v30  ;;  %312 = vst.msk [vmem:[#allocation2 + $0x21] sm:$0xff] %vm282_vm1, %v275_v31  ;;  %v270_v43 = vmax.f32 %v2891_v36, %v2899_v39  ;;  %v2900_v46 = vld [vmem:[%s3876_s13 + $0xe8] sm:$0xff]  ;;  %v229_v47 = vld [vmem:[%s3876_s13 + $0x30] sm:$0xff] }
  0x22   : > { %313 = vst.msk [vmem:[#allocation2 + $0x31] sm:$0xff] %vm282_vm1, %v276_v37  ;;  %v271_v48 = vmax.f32 %v2892_v45, %v2900_v46  ;;  %v2885_v49 = vld [vmem:[%s3876_s13 + $0x70] sm:$0xff]  ;;  %v230_v55 = vld [vmem:[%s3876_s13 + $0x38] sm:$0xff]  ;;  %v2922_v7 = vld [vmem:[%s4567_s1 + $0x8] sm:$0xf] }
  0x23   : > { %v277_v42 = vmax.f32 %v243_v32, %v269_v33  ;;  %v2893_v50 = vld [vmem:[%s3876_s13 + $0xb0] sm:$0xff]  ;;  %v278_v52 = vmax.f32 %v244_v38, %v270_v43  ;;  %v246_v53 = vmax.f32 %v229_v47, %v2885_v49  ;;  %v2886_v56 = vld [vmem:[%s3876_s13 + $0x78] sm:$0xff]  ;;  %v2932_v39 = vld [vmem:[%s4567_s1 + $0xc] sm:$0xf]  ;;  %1559 = vst.msk [vmem:[#allocation3 + $0x10] sm:$0x1] %vm1557_vm8, %v3729_v1 }
  0x24   : > { %v2901_v51 = vld [vmem:[%s3876_s13 + $0xf0] sm:$0xff]  ;;  %v2894_v57 = vld [vmem:[%s3876_s13 + $0xb8] sm:$0xff]  ;;  %v279_v58 = vmax.f32 %v245_v44, %v271_v48  ;;  %v247_v59 = vmax.f32 %v230_v55, %v2886_v56  ;;  %v635_v44 = vsel %vm632_vm5, %v633_v41, %v634_v40  ;;  %1560 = vst.msk [vmem:[#allocation3 + $0x20] sm:$0x1] %vm1557_vm8, %v3729_v1  ;;  %1561 = vst.msk [vmem:[#allocation3 + $0x30] sm:$0x1] %vm1557_vm8, %v3729_v1 }
  0x25   : > { %314 = vst.msk [vmem:[#allocation2 + $0x41] sm:$0xff] %vm282_vm1, %v277_v42  ;;  %v272_v54 = vmax.f32 %v2893_v50, %v2901_v51  ;;  %v2902_v60 = vld [vmem:[%s3876_s13 + $0xf8] sm:$0xff]  ;;  %315 = vst.msk [vmem:[#allocation2 + $0x51] sm:$0xff] %vm282_vm1, %v278_v52  ;;  %v2942_v51 = vld [vmem:[%s4567_s1 + $0x10] sm:$0xf]  ;;  %s3671_s13 = scalar_lea.vmem %s3670_s12, 2048 }
  0x26   : > { %v273_v62 = vmax.f32 %v2894_v57, %v2902_v60  ;;  %316 = vst.msk [vmem:[#allocation2 + $0x61] sm:$0xff] %vm282_vm1, %v279_v58  ;;  %p3673_p1 = scmp.lt.s32.totalorder %s3671_s13, %s3665_s10 }
  0x27   : > { %v280_v61 = vmax.f32 %v246_v53, %v272_v54  ;;  %1562 = vst.msk [vmem:[#allocation3 + $0x40] sm:$0x1] %vm1557_vm8, %v3729_v1  ;;  %1563 = vst.msk [vmem:[#allocation3 + $0x50] sm:$0x1] %vm1557_vm8, %v3729_v1 }
  0x28   : > { %v3923_v63 = vld [vmem:[#allocation2 + $0x10] sm:$0xff]  ;;  %v3925_v0 = vld [vmem:[#allocation2 + $0x18] sm:$0x3]  ;;  %v3931_v5 = vld [vmem:[#allocation2 + $0x20] sm:$0xff]  ;;  %v281_v8 = vmax.f32 %v247_v59, %v273_v62  ;;  %1564 = vst.msk [vmem:[#allocation3 + $0x60] sm:$0x1] %vm1557_vm8, %v3729_v1  ;;  %p3674_p2 = por %p3673_p1, %p3672_p0 }
  0x29   : > { %v360_v3 = vrot.slane %v3923_v63, 1  ;;  %v361_v4 = vrot.slane %v3925_v0, 1  ;;  %317 = vst.msk [vmem:[#allocation2 + $0x71] sm:$0xff] %vm282_vm1, %v280_v61  ;;  %v3933_v6 = vld [vmem:[#allocation2 + $0x28] sm:$0x3]  ;;  %v363_v12 = vrot.slane %v3931_v5, 1 }
  0x2a   : > { %v364_v13 = vrot.slane %v3933_v6, 1  ;;  %v3943_v14 = vld [vmem:[#allocation2 + $0x30] sm:$0xff]  ;;  %v3945_v15 = vld [vmem:[#allocation2 + $0x38] sm:$0x3]  ;;  %318 = vst.msk [vmem:[#allocation2 + $0x81] sm:$0xff] %vm282_vm1, %v281_v8  ;;  %v637_v42 = vrot.slane %v3925_v0, 2  ;;  %p3675_p3 = pnand %p3674_p2, %p3668_p13 }
  0x2b   : > { %v3939_v9 = vsel %vm356_vm4, %v360_v3, %v361_v4  ;;  %v366_v16 = vrot.slane %v3943_v14, 1  ;;  %v367_v17 = vrot.slane %v3945_v15, 1  ;;  %v636_v43 = vrot.slane %v3923_v63, 2  ;;  %v2952_v0 = vld [vmem:[%s4567_s1 + $0x14] sm:$0xf] }
  0x2c   : > { %3246 = vmatmul.mubr.msk.f32.vlgmr.msra.gmra.mrb[0].mxu0 %vm282_vm1, %v3939_v9  ;;  %v3951_v18 = vld [vmem:[#allocation2 + $0x40] sm:$0xff]  ;;  %v3953_v19 = vld [vmem:[#allocation2 + $0x48] sm:$0x3]  ;;  %v3959_v20 = vsel %vm356_vm4, %v363_v12, %v364_v13  ;;  %v3968_v24 = vld [vmem:[#allocation2 + $0x50] sm:$0xff]  ;;  %v639_v45 = vrot.slane %v3931_v5, 2  ;;  %v640_v46 = vrot.slane %v3933_v6, 2 }
  0x2d   : > { %3258 = vmatpush3.msk.msra.mxu0 %vm399_vm0, %v3824_v2  ;;  %v369_v21 = vrot.slane %v3951_v18, 1  ;;  %v370_v22 = vrot.slane %v3953_v19, 1  ;;  %3248 = vmatprep.mubr.msk.f32.mxu0 %vm282_vm1, %v3959_v20  ;;  %v3966_v23 = vsel %vm356_vm4, %v366_v16, %v367_v17  ;;  %v330_v25 = vld [vmem:[#allocation2 + $0x58] sm:$0x3]  ;;  %v372_v26 = vrot.slane %v3968_v24, 1  ;;  %v3975_v28 = vld [vmem:[#allocation2 + $0x60] sm:$0xff] }
  0x2e   : > { %3271 = vmatprep.subr.msk.mxu0 %vm399_vm0, %v2922_v7  ;;  %v373_v27 = vrot.slane %v330_v25, 1  ;;  %v332_v29 = vld [vmem:[#allocation2 + $0x68] sm:$0x3]  ;;  %v375_v30 = vrot.slane %v3975_v28, 1  ;;  %v642_v11 = vrot.slane %v3943_v14, 2  ;;  %v643_v47 = vrot.slane %v3945_v15, 2 }
  0x2f   : > { %v3972_v2 = vsel %vm356_vm4, %v369_v21, %v370_v22  ;;  %v376_v31 = vrot.slane %v332_v29, 1  ;;  %v4033_v48 = vsel %vm632_vm5, %v639_v45, %v640_v46  ;;  %v645_v49 = vrot.slane %v3951_v18, 2  ;;  %v2962_v3 = vld [vmem:[%s4567_s1 + $0x18] sm:$0xf]  ;;  %v2982_v16 = vld [vmem:[%s4567_s1 + $0x20] sm:$0xf] }
  0x30   : > { %3249 = vmatmul.mubr.msk.f32.gmra.mrb[2].mxu0 %vm282_vm1, %v3966_v23  ;;  %v3980_v32 = vld [vmem:[#allocation2 + $0x70] sm:$0xff]  ;;  %v334_v33 = vld [vmem:[#allocation2 + $0x78] sm:$0x3]  ;;  %v3985_v34 = vsel %vm356_vm4, %v372_v26, %v373_v27  ;;  %v646_v50 = vrot.slane %v3953_v19, 2  ;;  %v4045_v52 = vsel %vm632_vm5, %v642_v11, %v643_v47  ;;  %v648_v53 = vrot.slane %v3968_v24, 2  ;;  %v2993_v26 = vld [vmem:[%s4569_s3 + $0x8] sm:$0xff] }
  0x31   : > { %3251 = vmatprep.mubr.msk.f32.mxu0 %vm282_vm1, %v3972_v2  ;;  %v378_v35 = vrot.slane %v3980_v32, 1  ;;  %v379_v36 = vrot.slane %v334_v33, 1  ;;  %v3989_v37 = vsel %vm356_vm4, %v375_v30, %v376_v31  ;;  %v649_v54 = vrot.slane %v330_v25, 2  ;;  %v336_v4 = vld [vmem:[#allocation2 + $0x88] sm:$0x3]  ;;  %3369 = vmatprep.subr.mxu1 %v2993_v26 }
  0x32   : > { %v4049_v55 = vsel %vm632_vm5, %v645_v49, %v646_v50  ;;  %v651_v56 = vrot.slane %v3975_v28, 2  ;;  %v652_v57 = vrot.slane %v332_v29, 2  ;;  %v654_v59 = vrot.slane %v3980_v32, 2  ;;  %1565 = vst.msk [vmem:[#allocation3 + $0x70] sm:$0x1] %vm1557_vm8, %v3729_v1  ;;  %3370 = vmatpush3.msra.mxu1 %v2993_v26 }
  0x33   : > { %v3996_v38 = vsel %vm356_vm4, %v378_v35, %v379_v36  ;;  %v4058_v58 = vsel %vm632_vm5, %v648_v53, %v649_v54  ;;  %v655_v60 = vrot.slane %v334_v33, 2  ;;  %v1037_v13 = vrot.slane %v336_v4, 2  ;;  %1566 = vst.msk [vmem:[#allocation3 + $0x80] sm:$0x1] %vm1557_vm8, %v3729_v1  ;;  %1567 = vst.msk [vmem:[#allocation3 + $0x90] sm:$0x1] %vm1557_vm8, %v3729_v1 }
  0x34   : > { %3252 = vmatmul.mubr.msk.f32.gmra.mrb[4].mxu0 %vm282_vm1, %v3985_v34  ;;  %v4062_v61 = vsel %vm632_vm5, %v651_v56, %v652_v57  ;;  %1569 = vst.msk [vmem:[#allocation3 + $0x19] sm:$0x1] %vm1557_vm8, %v3729_v1  ;;  %1570 = vst.msk [vmem:[#allocation3 + $0x29] sm:$0x1] %vm1557_vm8, %v3729_v1 }
  0x35   : > { %3254 = vmatprep.mubr.msk.f32.mxu0 %vm282_vm1, %v3989_v37  ;;  %v4069_v62 = vsel %vm632_vm5, %v654_v59, %v655_v60  ;;  %1571 = vst.msk [vmem:[#allocation3 + $0x39] sm:$0x1] %vm1557_vm8, %v3729_v1  ;;  %1572 = vst.msk [vmem:[#allocation3 + $0x49] sm:$0x1] %vm1557_vm8, %v3729_v1 }
  0x36   : > { %1573 = vst.msk [vmem:[#allocation3 + $0x59] sm:$0x1] %vm1557_vm8, %v3729_v1  ;;  %1574 = vst.msk [vmem:[#allocation3 + $0x69] sm:$0x1] %vm1557_vm8, %v3729_v1 }
  0x37   : > { %1575 = vst.msk [vmem:[#allocation3 + $0x79] sm:$0x1] %vm1557_vm8, %v3729_v1  ;;  %1576 = vst.msk [vmem:[#allocation3 + $0x89] sm:$0x1] %vm1557_vm8, %v3729_v1 }
  0x38   : > { %3255 = vmatmul.mubr.msk.f32.gmra.mrb[6].mxu0 %vm282_vm1, %v3996_v38  ;;  %1577 = vst.msk [vmem:[#allocation3 + $0x99] sm:$0x1] %vm1557_vm8, %v3729_v1  ;;  %v1607_v1 = vld [vmem:[%s4569_s3] sm:$0xff] }
  0x39   : > { %3259 = vmatprep.mubr.msk.f32.mxu0 %vm282_vm1, %v3884_v10  ;;  %v638_v10 = vsel %vm632_vm5, %v636_v43, %v637_v42  ;;  %3383 = vmatprep.subr.mxu1 %v1607_v1 }
  0x3c   : > { %3260 = vmatmul.mubr.msk.f32.vlgmr.msra.gmra.mrb[0].mxu0 %vm282_vm1, %v3923_v63 }
  0x3d   : > { %3272 = vmatpush3.msk.msra.mxu0 %vm399_vm0, %v2922_v7  ;;  %3262 = vmatprep.mubr.msk.f32.mxu0 %vm282_vm1, %v3931_v5  ;;  %v914_v7 = vrot.slane %v336_v4, 1 }
  0x3e   : > { %3285 = vmatprep.subr.msk.mxu0 %vm399_vm0, %v2932_v39 }
  0x40   : > { %3263 = vmatmul.mubr.msk.f32.gmra.mrb[2].mxu0 %vm282_vm1, %v3943_v14 }
  0x41   : > { %3265 = vmatprep.mubr.msk.f32.mxu0 %vm282_vm1, %v3951_v18 }
  0x44   : > { %3266 = vmatmul.mubr.msk.f32.gmra.mrb[4].mxu0 %vm282_vm1, %v3968_v24 }
  0x45   : > { %3268 = vmatprep.mubr.msk.f32.mxu0 %vm282_vm1, %v3975_v28 }
  0x48   : > { %3269 = vmatmul.mubr.msk.f32.gmra.mrb[6].mxu0 %vm282_vm1, %v3980_v32 }
  0x49   : > { %3273 = vmatprep.mubr.msk.f32.mxu0 %vm282_vm1, %v635_v44 }
  0x4c   : > { %3274 = vmatmul.mubr.msk.f32.vlgmr.msra.gmra.mrb[0].mxu0 %vm282_vm1, %v638_v10 }
  0x4d   : > { %3286 = vmatpush3.msk.msra.mxu0 %vm399_vm0, %v2932_v39  ;;  %3276 = vmatprep.mubr.msk.f32.mxu0 %vm282_vm1, %v4033_v48 }
  0x4e   : > { %3299 = vmatprep.subr.msk.mxu0 %vm399_vm0, %v2942_v51 }
  0x50   : > { %3277 = vmatmul.mubr.msk.f32.gmra.mrb[2].mxu0 %vm282_vm1, %v4045_v52 }
  0x51   : > { %3279 = vmatprep.mubr.msk.f32.mxu0 %vm282_vm1, %v4049_v55 }
  0x54   : > { %3280 = vmatmul.mubr.msk.f32.gmra.mrb[4].mxu0 %vm282_vm1, %v4058_v58 }
  0x55   : > { %3282 = vmatprep.mubr.msk.f32.mxu0 %vm282_vm1, %v4062_v61 }
  0x58   : > { %3283 = vmatmul.mubr.msk.f32.gmra.mrb[6].mxu0 %vm282_vm1, %v4069_v62 }
  0x59   : > { %3287 = vmatprep.mubr.msk.f32.mxu0 %vm282_vm1, %v3923_v63  ;;  %v335_v63 = vld [vmem:[#allocation2 + $0x80] sm:$0xff] }
  0x5a   : > { %v913_v6 = vrot.slane %v335_v63, 1  ;;  %v1036_v12 = vrot.slane %v335_v63, 2 }
  0x5c   : > { %3288 = vmatmul.mubr.msk.f32.vlgmr.msra.gmra.mrb[0].mxu0 %vm282_vm1, %v3931_v5  ;;  %v915_v8 = vsel %vm356_vm4, %v913_v6, %v914_v7  ;;  %v1038_v15 = vsel %vm632_vm5, %v1036_v12, %v1037_v13 }
  0x5d   : > { %3300 = vmatpush3.msk.msra.mxu0 %vm399_vm0, %v2942_v51  ;;  %3290 = vmatprep.mubr.msk.f32.mxu0 %vm282_vm1, %v3943_v14 }
  0x5e   : > { %3313 = vmatprep.subr.msk.mxu0 %vm399_vm0, %v2952_v0 }
  0x60   : > { %3291 = vmatmul.mubr.msk.f32.gmra.mrb[2].mxu0 %vm282_vm1, %v3951_v18 }
  0x61   : > { %3293 = vmatprep.mubr.msk.f32.mxu0 %vm282_vm1, %v3968_v24 }
  0x64   : > { %3294 = vmatmul.mubr.msk.f32.gmra.mrb[4].mxu0 %vm282_vm1, %v3975_v28 }
  0x65   : > { %3296 = vmatprep.mubr.msk.f32.mxu0 %vm282_vm1, %v3980_v32 }
  0x68   : > { %3297 = vmatmul.mubr.msk.f32.gmra.mrb[6].mxu0 %vm282_vm1, %v335_v63 }
  0x69   : > { %3301 = vmatprep.mubr.msk.f32.mxu0 %vm282_vm1, %v3939_v9  ;;  %v2972_v9 = vld [vmem:[%s4567_s1 + $0x1c] sm:$0xf] }
  0x6c   : > { %3302 = vmatmul.mubr.msk.f32.vlgmr.msra.gmra.mrb[0].mxu0 %vm282_vm1, %v3959_v20 }
  0x6d   : > { %3314 = vmatpush3.msk.msra.mxu0 %vm399_vm0, %v2952_v0  ;;  %3304 = vmatprep.mubr.msk.f32.mxu0 %vm282_vm1, %v3966_v23 }
  0x6e   : > { %3327 = vmatprep.subr.msk.mxu0 %vm399_vm0, %v2962_v3 }
  0x70   : > { %3305 = vmatmul.mubr.msk.f32.gmra.mrb[2].mxu0 %vm282_vm1, %v3972_v2 }
  0x71   : > { %3307 = vmatprep.mubr.msk.f32.mxu0 %vm282_vm1, %v3985_v34 }
  0x74   : > { %3308 = vmatmul.mubr.msk.f32.gmra.mrb[4].mxu0 %vm282_vm1, %v3989_v37 }
  0x75   : > { %3310 = vmatprep.mubr.msk.f32.mxu0 %vm282_vm1, %v3996_v38 }
  0x78   : > { %3311 = vmatmul.mubr.msk.f32.gmra.mrb[6].mxu0 %vm282_vm1, %v915_v8 }
  0x79   : > { %3315 = vmatprep.mubr.msk.f32.mxu0 %vm282_vm1, %v638_v10 }
  0x7c   : > { %3316 = vmatmul.mubr.msk.f32.vlgmr.msra.gmra.mrb[0].mxu0 %vm282_vm1, %v4033_v48 }
  0x7d   : > { %3328 = vmatpush3.msk.msra.mxu0 %vm399_vm0, %v2962_v3  ;;  %3318 = vmatprep.mubr.msk.f32.mxu0 %vm282_vm1, %v4045_v52 }
  0x7e   : > { %3341 = vmatprep.subr.msk.mxu0 %vm399_vm0, %v2972_v9 }
  0x80   : > { %3319 = vmatmul.mubr.msk.f32.gmra.mrb[2].mxu0 %vm282_vm1, %v4049_v55 }
  0x81   : > { %3321 = vmatprep.mubr.msk.f32.mxu0 %vm282_vm1, %v4058_v58 }
  0x84   : > { %3322 = vmatmul.mubr.msk.f32.gmra.mrb[4].mxu0 %vm282_vm1, %v4062_v61 }
  0x85   : > { %3324 = vmatprep.mubr.msk.f32.mxu0 %vm282_vm1, %v4069_v62 }
  0x88   : > { %3325 = vmatmul.mubr.msk.f32.gmra.mrb[6].mxu0 %vm282_vm1, %v1038_v15 }
  0x89   : > { %3329 = vmatprep.mubr.msk.f32.mxu0 %vm282_vm1, %v3931_v5  ;;  %v337_v5 = vld [vmem:[#allocation2 + $0x90] sm:$0xff] }
  0x8a   : > { %v1281_v17 = vrot.slane %v337_v5, 1 }
  0x8c   : > { %3330 = vmatmul.mubr.msk.f32.vlgmr.msra.gmra.mrb[0].mxu0 %vm282_vm1, %v3943_v14  ;;  %v338_v14 = vld [vmem:[#allocation2 + $0x98] sm:$0x3] }
  0x8d   : > { %3342 = vmatpush3.msk.msra.mxu0 %vm399_vm0, %v2972_v9  ;;  %3332 = vmatprep.mubr.msk.f32.mxu0 %vm282_vm1, %v3951_v18  ;;  %v1282_v18 = vrot.slane %v338_v14, 1  ;;  %v1405_v21 = vrot.slane %v338_v14, 2 }
  0x8e   : > { %3355 = vmatprep.subr.msk.mxu0 %vm399_vm0, %v2982_v16 }
  0x8f   : > { %v1283_v19 = vsel %vm356_vm4, %v1281_v17, %v1282_v18 }
  0x90   : > { %3333 = vmatmul.mubr.msk.f32.gmra.mrb[2].mxu0 %vm282_vm1, %v3968_v24  ;;  %v4232_v24 = vld [vmem:[#allocation3 + $0x8] sm:$0x3] }
  0x91   : > { %3335 = vmatprep.mubr.msk.f32.mxu0 %vm282_vm1, %v3975_v28  ;;  %v2992_v28 = vld [vmem:[%s4568_s2] ss:$0 sm:$0xff] }
  0x94   : > { %3336 = vmatmul.mubr.msk.f32.gmra.mrb[4].mxu0 %vm282_vm1, %v3980_v32 }
  0x95   : > { %3338 = vmatprep.mubr.msk.f32.mxu0 %vm282_vm1, %v335_v63 }
  0x98   : > { %3339 = vmatmul.mubr.msk.f32.gmra.mrb[6].mxu0 %vm282_vm1, %v337_v5 }
  0x99   : > { %3343 = vmatprep.mubr.msk.f32.mxu0 %vm282_vm1, %v3959_v20  ;;  %v1404_v20 = vrot.slane %v337_v5, 2 }
  0x9b   : > { %v1406_v22 = vsel %vm632_vm5, %v1404_v20, %v1405_v21 }
  0x9c   : > { %3344 = vmatmul.mubr.msk.f32.vlgmr.msra.gmra.mrb[0].mxu0 %vm282_vm1, %v3966_v23  ;;  %v4230_v23 = vld [vmem:[#allocation3] sm:$0xff] }
  0x9d   : > { %3356 = vmatpush3.msk.msra.mxu0 %vm399_vm0, %v2982_v16  ;;  %3346 = vmatprep.mubr.msk.f32.mxu0 %vm282_vm1, %v3972_v2  ;;  %v1624_v25 = vrot.slane %v4230_v23, 1  ;;  %v1625_v2 = vrot.slane %v4232_v24, 1 }
  0x9f   : > { %v1626_v27 = vsel %vm356_vm4, %v1624_v25, %v1625_v2 }
  0xa0   : > { %3347 = vmatmul.mubr.msk.f32.gmra.mrb[2].mxu0 %vm282_vm1, %v3985_v34  ;;  %3371 = vmatprep.mubr.msk.f32.mxu1 %vm1550_vm6, %v1626_v27 }
  0xa1   : > { %3349 = vmatprep.mubr.msk.f32.mxu0 %vm282_vm1, %v3989_v37 }
  0xa4   : > { %3350 = vmatmul.mubr.msk.f32.gmra.mrb[4].mxu0 %vm282_vm1, %v3996_v38 }
  0xa5   : > { %3352 = vmatprep.mubr.msk.f32.mxu0 %vm282_vm1, %v915_v8 }
  0xa8   : > { %3353 = vmatmul.mubr.msk.f32.gmra.mrb[6].mxu0 %vm282_vm1, %v1283_v19 }
  0xa9   : > { %3357 = vmatprep.mubr.msk.f32.mxu0 %vm282_vm1, %v4033_v48 }
  0xac   : > { %3358 = vmatmul.mubr.msk.f32.vlgmr.msra.gmra.mrb[0].mxu0 %vm282_vm1, %v4045_v52 }
  0xad   : > { %3360 = vmatprep.mubr.msk.f32.mxu0 %vm282_vm1, %v4049_v55 }
  0xb0   : > { %3361 = vmatmul.mubr.msk.f32.gmra.mrb[2].mxu0 %vm282_vm1, %v4058_v58 }
  0xb1   : > { %3363 = vmatprep.mubr.msk.f32.mxu0 %vm282_vm1, %v4062_v61 }
  0xb4   : > { %3364 = vmatmul.mubr.msk.f32.gmra.mrb[4].mxu0 %vm282_vm1, %v4069_v62  ;;  %v3010_v62 = vld [vmem:[%s4569_s3 + $0x10] sm:$0xff] }
  0xb5   : > { %3366 = vmatprep.mubr.msk.f32.mxu0 %vm282_vm1, %v1038_v15 }
  0xb8   : > { %3367 = vmatmul.mubr.msk.f32.gmra.mrb[6].mxu0 %vm282_vm1, %v1406_v22 }
 0x17f   : > { %v3359_v29 = vpop.f32.mrb[0].mxu0 }
 0x180   : > { %v1535_v30 = vadd.f32 %v3359_v29, %v2992_v28  ;;  %v1480_v31 = vpop.f32.mrb[1].mxu0  ;;  %v1892_v29 = vrot.slane %v4230_v23, 2 }
 0x181   : > { %v1534_v32 = vadd.f32 %v2992_v28, %v1480_v31 }
 0x182   : > { %v1543_v33 = vmax.f32 %v1535_v30, 0.0 }
 0x183   : > { %v1542_v34 = vmax.f32 %v1534_v32, 0.0  ;;  %v3362_v35 = vpop.f32.mrb[2].mxu0 }
 0x184   : > { %1580 = vst.msk [vmem:[#allocation3 + $0x21] sm:$0xff] %vm1550_vm6, %v1543_v33  ;;  %v1537_v36 = vadd.f32 %v3362_v35, %v2992_v28  ;;  %v1490_v37 = vpop.f32.mrb[3].mxu0 }
 0x185   : > { %1579 = vst.msk [vmem:[#allocation3 + $0x11] sm:$0xff] %vm1550_vm6, %v1542_v34  ;;  %v1536_v38 = vadd.f32 %v2992_v28, %v1490_v37 }
 0x186   : > { %v1545_v39 = vmax.f32 %v1537_v36, 0.0  ;;  %v3028_v36 = vld [vmem:[%s4569_s3 + $0x20] sm:$0xff] }
 0x187   : > { %v1544_v40 = vmax.f32 %v1536_v38, 0.0  ;;  %v3365_v41 = vpop.f32.mrb[4].mxu0 }
 0x188   : > { %1582 = vst.msk [vmem:[#allocation3 + $0x41] sm:$0xff] %vm1550_vm6, %v1545_v39  ;;  %v1539_v42 = vadd.f32 %v3365_v41, %v2992_v28  ;;  %v1500_v43 = vpop.f32.mrb[5].mxu0 }
 0x189   : > { %1581 = vst.msk [vmem:[#allocation3 + $0x31] sm:$0xff] %vm1550_vm6, %v1544_v40  ;;  %v1538_v44 = vadd.f32 %v2992_v28, %v1500_v43 }
 0x18a   : > { %v1547_v45 = vmax.f32 %v1539_v42, 0.0 }
 0x18b   : > { %v1546_v46 = vmax.f32 %v1538_v44, 0.0  ;;  %v3368_v10 = vpop.f32.mrb[6].mxu0  ;;  %v4251_v11 = vld [vmem:[#allocation3 + $0x20] sm:$0xff]  ;;  %v4253_v47 = vld [vmem:[#allocation3 + $0x28] sm:$0x3] }
 0x18c   : > { %1584 = vst.msk [vmem:[#allocation3 + $0x61] sm:$0xff] %vm1550_vm6, %v1547_v45  ;;  %v1541_v48 = vadd.f32 %v3368_v10, %v2992_v28  ;;  %v1510_v49 = vpop.f32.mrb[7].mxu0  ;;  %v4256_v50 = vld [vmem:[#allocation3 + $0x10] sm:$0xff]  ;;  %v4258_v51 = vld [vmem:[#allocation3 + $0x18] sm:$0x3]  ;;  %v1630_v52 = vrot.slane %v4251_v11, 1 }
 0x18d   : > { %v1631_v53 = vrot.slane %v4253_v47, 1  ;;  %1583 = vst.msk [vmem:[#allocation3 + $0x51] sm:$0xff] %vm1550_vm6, %v1546_v46  ;;  %v1540_v54 = vadd.f32 %v2992_v28, %v1510_v49  ;;  %v1627_v55 = vrot.slane %v4256_v50, 1  ;;  %v1628_v56 = vrot.slane %v4258_v51, 1 }
 0x18e   : > { %v1549_v57 = vmax.f32 %v1541_v48, 0.0  ;;  %v1893_v28 = vrot.slane %v4232_v24, 2  ;;  %v1896_v31 = vrot.slane %v4258_v51, 2  ;;  %v1895_v32 = vrot.slane %v4256_v50, 2  ;;  %v3037_v51 = vld [vmem:[%s4569_s3 + $0x28] sm:$0xff] }
 0x18f   : > { %v1548_v58 = vmax.f32 %v1540_v54, 0.0  ;;  %v4266_v59 = vsel %vm356_vm4, %v1627_v55, %v1628_v56  ;;  %v4268_v60 = vld [vmem:[#allocation3 + $0x40] sm:$0xff]  ;;  %v4270_v61 = vld [vmem:[#allocation3 + $0x48] sm:$0x3]  ;;  %v4279_v0 = vsel %vm356_vm4, %v1630_v52, %v1631_v53  ;;  %v1898_v33 = vrot.slane %v4251_v11, 2  ;;  %v3046_v52 = vld [vmem:[%s4569_s3 + $0x30] sm:$0xff] }
 0x190   : > { %1586 = vst.msk [vmem:[#allocation3 + $0x81] sm:$0xff] %vm1550_vm6, %v1549_v57  ;;  %3372 = vmatmul.mubr.msk.f32.vlgmr.msra.gmra.mrb[0].mxu1 %vm1550_vm6, %v4266_v59  ;;  %v4281_v63 = vld [vmem:[#allocation3 + $0x30] sm:$0xff]  ;;  %v4283_v3 = vld [vmem:[#allocation3 + $0x38] sm:$0x3]  ;;  %v1636_v4 = vrot.slane %v4268_v60, 1  ;;  %v1637_v6 = vrot.slane %v4270_v61, 1  ;;  %v1894_v30 = vsel %vm632_vm5, %v1892_v29, %v1893_v28 }
 0x191   : > { %1585 = vst.msk [vmem:[#allocation3 + $0x71] sm:$0xff] %vm1550_vm6, %v1548_v58  ;;  %3384 = vmatpush3.msra.mxu1 %v1607_v1  ;;  %3374 = vmatprep.mubr.msk.f32.mxu1 %vm1550_vm6, %v4279_v0  ;;  %v1633_v7 = vrot.slane %v4281_v63, 1  ;;  %v1634_v8 = vrot.slane %v4283_v3, 1  ;;  %v3019_v1 = vld [vmem:[%s4569_s3 + $0x18] sm:$0xff]  ;;  %v1899_v24 = vrot.slane %v4253_v47, 2  ;;  %v1901_v34 = vrot.slane %v4281_v63, 2 }
 0x192   : > { %3397 = vmatprep.subr.mxu1 %v3010_v62  ;;  %v4302_v15 = vsel %vm356_vm4, %v1636_v4, %v1637_v6  ;;  %v1902_v35 = vrot.slane %v4283_v3, 2  ;;  %v1904_v38 = vrot.slane %v4268_v60, 2  ;;  %v1905_v39 = vrot.slane %v4270_v61, 2  ;;  %v3055_v57 = vld [vmem:[%s4569_s3 + $0x38] sm:$0xff] }
 0x193   : > { %v4293_v9 = vsel %vm356_vm4, %v1633_v7, %v1634_v8  ;;  %v4295_v12 = vld [vmem:[#allocation3 + $0x60] sm:$0xff]  ;;  %v4297_v13 = vld [vmem:[#allocation3 + $0x68] sm:$0x3]  ;;  %v4364_v37 = vsel %vm632_vm5, %v1898_v33, %v1899_v24 }
 0x194   : > { %3375 = vmatmul.mubr.msk.f32.gmra.mrb[2].mxu1 %vm1550_vm6, %v4293_v9  ;;  %v4304_v16 = vld [vmem:[#allocation3 + $0x50] sm:$0xff]  ;;  %v1598_v5 = vld [vmem:[#allocation3 + $0x58] sm:$0x3]  ;;  %v1642_v14 = vrot.slane %v4295_v12, 1  ;;  %v1643_v17 = vrot.slane %v4297_v13, 1  ;;  %v4371_v40 = vsel %vm632_vm5, %v1901_v34, %v1902_v35  ;;  %v4377_v43 = vsel %vm632_vm5, %v1904_v38, %v1905_v39 }
 0x195   : > { %3377 = vmatprep.mubr.msk.f32.mxu1 %vm1550_vm6, %v4302_v15  ;;  %v1639_v18 = vrot.slane %v4304_v16, 1  ;;  %v1640_v19 = vrot.slane %v1598_v5, 1  ;;  %v1907_v41 = vrot.slane %v4304_v16, 2  ;;  %v1908_v42 = vrot.slane %v1598_v5, 2  ;;  %v3073_v8 = vld [vmem:[%s4570_s4] ss:$0 sm:$0xff] }
 0x196   : > { %v4317_v21 = vsel %vm356_vm4, %v1642_v14, %v1643_v17  ;;  %v1910_v44 = vrot.slane %v4295_v12, 2  ;;  %v1911_v45 = vrot.slane %v4297_v13, 2 }
 0x197   : > { %v4312_v20 = vsel %vm356_vm4, %v1639_v18, %v1640_v19  ;;  %v4384_v46 = vsel %vm632_vm5, %v1907_v41, %v1908_v42  ;;  %v1604_v53 = vld [vmem:[#allocation3 + $0x88] sm:$0x3] }
 0x198   : > { %3378 = vmatmul.mubr.msk.f32.gmra.mrb[4].mxu1 %vm1550_vm6, %v4312_v20  ;;  %v4319_v22 = vld [vmem:[#allocation3 + $0x70] sm:$0xff]  ;;  %v1602_v25 = vld [vmem:[#allocation3 + $0x78] sm:$0x3]  ;;  %v4390_v48 = vsel %vm632_vm5, %v1910_v44, %v1911_v45  ;;  %v2167_v55 = vrot.slane %v1604_v53, 1 }
 0x199   : > { %3380 = vmatprep.mubr.msk.f32.mxu1 %vm1550_vm6, %v4317_v21  ;;  %v1645_v2 = vrot.slane %v4319_v22, 1  ;;  %v1646_v26 = vrot.slane %v1602_v25, 1  ;;  %v1913_v10 = vrot.slane %v4319_v22, 2  ;;  %v1914_v47 = vrot.slane %v1602_v25, 2 }
 0x19b   : > { %v4325_v27 = vsel %vm356_vm4, %v1645_v2, %v1646_v26  ;;  %v4395_v49 = vsel %vm632_vm5, %v1913_v10, %v1914_v47 }
 0x19c   : > { %3381 = vmatmul.mubr.msk.f32.gmra.mrb[6].mxu1 %vm1550_vm6, %v4325_v27 }
 0x19d   : > { %3385 = vmatprep.mubr.msk.f32.mxu1 %vm1550_vm6, %v4230_v23  ;;  %v1897_v23 = vsel %vm632_vm5, %v1895_v32, %v1896_v31 }
 0x1a0   : > { %3386 = vmatmul.mubr.msk.f32.vlgmr.msra.gmra.mrb[0].mxu1 %vm1550_vm6, %v4256_v50 }
 0x1a1   : > { %3398 = vmatpush3.msra.mxu1 %v3010_v62  ;;  %3388 = vmatprep.mubr.msk.f32.mxu1 %vm1550_vm6, %v4251_v11  ;;  %v3064_v62 = vld [vmem:[%s4569_s3 + $0x40] sm:$0xff] }
 0x1a2   : > { %3411 = vmatprep.subr.mxu1 %v3019_v1 }
 0x1a4   : > { %3389 = vmatmul.mubr.msk.f32.gmra.mrb[2].mxu1 %vm1550_vm6, %v4281_v63 }
 0x1a5   : > { %3391 = vmatprep.mubr.msk.f32.mxu1 %vm1550_vm6, %v4268_v60 }
 0x1a8   : > { %3392 = vmatmul.mubr.msk.f32.gmra.mrb[4].mxu1 %vm1550_vm6, %v4304_v16 }
 0x1a9   : > { %3394 = vmatprep.mubr.msk.f32.mxu1 %vm1550_vm6, %v4295_v12 }
 0x1ac   : > { %3395 = vmatmul.mubr.msk.f32.gmra.mrb[6].mxu1 %vm1550_vm6, %v4319_v22 }
 0x1ad   : > { %3399 = vmatprep.mubr.msk.f32.mxu1 %vm1550_vm6, %v1894_v30 }
 0x1b0   : > { %3400 = vmatmul.mubr.msk.f32.vlgmr.msra.gmra.mrb[0].mxu1 %vm1550_vm6, %v1897_v23 }
 0x1b1   : > { %3412 = vmatpush3.msra.mxu1 %v3019_v1  ;;  %3402 = vmatprep.mubr.msk.f32.mxu1 %vm1550_vm6, %v4364_v37 }
 0x1b2   : > { %3425 = vmatprep.subr.mxu1 %v3028_v36 }
 0x1b4   : > { %3403 = vmatmul.mubr.msk.f32.gmra.mrb[2].mxu1 %vm1550_vm6, %v4371_v40 }
 0x1b5   : > { %3405 = vmatprep.mubr.msk.f32.mxu1 %vm1550_vm6, %v4377_v43 }
 0x1b8   : > { %3406 = vmatmul.mubr.msk.f32.gmra.mrb[4].mxu1 %vm1550_vm6, %v4384_v46 }
 0x1b9   : > { %3408 = vmatprep.mubr.msk.f32.mxu1 %vm1550_vm6, %v4390_v48 }
 0x1bc   : > { %3409 = vmatmul.mubr.msk.f32.gmra.mrb[6].mxu1 %vm1550_vm6, %v4395_v49 }
 0x1bd   : > { %3413 = vmatprep.mubr.msk.f32.mxu1 %vm1550_vm6, %v4256_v50  ;;  %v1603_v50 = vld [vmem:[#allocation3 + $0x80] sm:$0xff] }
 0x1be   : > { %v2166_v54 = vrot.slane %v1603_v50, 1  ;;  %v2286_v58 = vrot.slane %v1603_v50, 2 }
 0x1c0   : > { %3414 = vmatmul.mubr.msk.f32.vlgmr.msra.gmra.mrb[0].mxu1 %vm1550_vm6, %v4251_v11  ;;  %v2168_v56 = vsel %vm356_vm4, %v2166_v54, %v2167_v55 }
 0x1c1   : > { %3426 = vmatpush3.msra.mxu1 %v3028_v36  ;;  %3416 = vmatprep.mubr.msk.f32.mxu1 %vm1550_vm6, %v4281_v63 }
 0x1c2   : > { %3439 = vmatprep.subr.mxu1 %v3037_v51 }
 0x1c4   : > { %3417 = vmatmul.mubr.msk.f32.gmra.mrb[2].mxu1 %vm1550_vm6, %v4268_v60 }
 0x1c5   : > { %3419 = vmatprep.mubr.msk.f32.mxu1 %vm1550_vm6, %v4304_v16 }
 0x1c8   : > { %3420 = vmatmul.mubr.msk.f32.gmra.mrb[4].mxu1 %vm1550_vm6, %v4295_v12 }
 0x1c9   : > { %3422 = vmatprep.mubr.msk.f32.mxu1 %vm1550_vm6, %v4319_v22 }
 0x1cc   : > { %3423 = vmatmul.mubr.msk.f32.gmra.mrb[6].mxu1 %vm1550_vm6, %v1603_v50 }
 0x1cd   : > { %3427 = vmatprep.mubr.msk.f32.mxu1 %vm1550_vm6, %v4266_v59  ;;  %v2287_v59 = vrot.slane %v1604_v53, 2 }
 0x1cf   : > { %v2288_v61 = vsel %vm632_vm5, %v2286_v58, %v2287_v59 }
 0x1d0   : > { %3428 = vmatmul.mubr.msk.f32.vlgmr.msra.gmra.mrb[0].mxu1 %vm1550_vm6, %v4279_v0 }
 0x1d1   : > { %3440 = vmatpush3.msra.mxu1 %v3037_v51  ;;  %3430 = vmatprep.mubr.msk.f32.mxu1 %vm1550_vm6, %v4293_v9 }
 0x1d2   : > { %3453 = vmatprep.subr.mxu1 %v3046_v52 }
 0x1d4   : > { %3431 = vmatmul.mubr.msk.f32.gmra.mrb[2].mxu1 %vm1550_vm6, %v4302_v15 }
 0x1d5   : > { %3433 = vmatprep.mubr.msk.f32.mxu1 %vm1550_vm6, %v4312_v20 }
 0x1d8   : > { %3434 = vmatmul.mubr.msk.f32.gmra.mrb[4].mxu1 %vm1550_vm6, %v4317_v21 }
 0x1d9   : > { %3436 = vmatprep.mubr.msk.f32.mxu1 %vm1550_vm6, %v4325_v27 }
 0x1dc   : > { %3437 = vmatmul.mubr.msk.f32.gmra.mrb[6].mxu1 %vm1550_vm6, %v2168_v56 }
 0x1dd   : > { %3441 = vmatprep.mubr.msk.f32.mxu1 %vm1550_vm6, %v1897_v23 }
 0x1e0   : > { %3442 = vmatmul.mubr.msk.f32.vlgmr.msra.gmra.mrb[0].mxu1 %vm1550_vm6, %v4364_v37 }
 0x1e1   : > { %3454 = vmatpush3.msra.mxu1 %v3046_v52  ;;  %3444 = vmatprep.mubr.msk.f32.mxu1 %vm1550_vm6, %v4371_v40 }
 0x1e2   : > { %3467 = vmatprep.subr.mxu1 %v3055_v57 }
 0x1e4   : > { %3445 = vmatmul.mubr.msk.f32.gmra.mrb[2].mxu1 %vm1550_vm6, %v4377_v43 }
 0x1e5   : > { %3447 = vmatprep.mubr.msk.f32.mxu1 %vm1550_vm6, %v4384_v46 }
 0x1e8   : > { %3448 = vmatmul.mubr.msk.f32.gmra.mrb[4].mxu1 %vm1550_vm6, %v4390_v48 }
 0x1e9   : > { %3450 = vmatprep.mubr.msk.f32.mxu1 %vm1550_vm6, %v4395_v49 }
 0x1ec   : > { %3451 = vmatmul.mubr.msk.f32.gmra.mrb[6].mxu1 %vm1550_vm6, %v2288_v61 }
 0x1ed   : > { %3455 = vmatprep.mubr.msk.f32.mxu1 %vm1550_vm6, %v4251_v11  ;;  %v1605_v11 = vld [vmem:[#allocation3 + $0x90] sm:$0xff] }
 0x1ee   : > { %v2645_v4 = vrot.slane %v1605_v11, 2 }
 0x1f0   : > { %3456 = vmatmul.mubr.msk.f32.vlgmr.msra.gmra.mrb[0].mxu1 %vm1550_vm6, %v4281_v63  ;;  %v2525_v63 = vrot.slane %v1605_v11, 1 }
 0x1f1   : > { %3468 = vmatpush3.msra.mxu1 %v3055_v57  ;;  %3458 = vmatprep.mubr.msk.f32.mxu1 %vm1550_vm6, %v4268_v60  ;;  %v1606_v60 = vld [vmem:[#allocation3 + $0x98] sm:$0x3] }
 0x1f2   : > { %3481 = vmatprep.subr.mxu1 %v3064_v62  ;;  %v2526_v3 = vrot.slane %v1606_v60, 1  ;;  %v2646_v6 = vrot.slane %v1606_v60, 2 }
 0x1f4   : > { %3459 = vmatmul.mubr.msk.f32.gmra.mrb[2].mxu1 %vm1550_vm6, %v4304_v16  ;;  %v2647_v7 = vsel %vm632_vm5, %v2645_v4, %v2646_v6 }
 0x1f5   : > { %3461 = vmatprep.mubr.msk.f32.mxu1 %vm1550_vm6, %v4295_v12 }
 0x1f8   : > { %3462 = vmatmul.mubr.msk.f32.gmra.mrb[4].mxu1 %vm1550_vm6, %v4319_v22 }
 0x1f9   : > { %3464 = vmatprep.mubr.msk.f32.mxu1 %vm1550_vm6, %v1603_v50 }
 0x1fc   : > { %3465 = vmatmul.mubr.msk.f32.gmra.mrb[6].mxu1 %vm1550_vm6, %v1605_v11 }
 0x1fd   : > { %3469 = vmatprep.mubr.msk.f32.mxu1 %vm1550_vm6, %v4279_v0  ;;  %v2527_v0 = vsel %vm356_vm4, %v2525_v63, %v2526_v3 }
 0x200   : > { %3470 = vmatmul.mubr.msk.f32.vlgmr.msra.gmra.mrb[0].mxu1 %vm1550_vm6, %v4293_v9 }
 0x201   : > { %3482 = vmatpush3.msra.mxu1 %v3064_v62  ;;  %3472 = vmatprep.mubr.msk.f32.mxu1 %vm1550_vm6, %v4302_v15 }
 0x204   : > { %3473 = vmatmul.mubr.msk.f32.gmra.mrb[2].mxu1 %vm1550_vm6, %v4312_v20 }
 0x205   : > { %3475 = vmatprep.mubr.msk.f32.mxu1 %vm1550_vm6, %v4317_v21 }
 0x208   : > { %3476 = vmatmul.mubr.msk.f32.gmra.mrb[4].mxu1 %vm1550_vm6, %v4325_v27 }
 0x209   : > { %3478 = vmatprep.mubr.msk.f32.mxu1 %vm1550_vm6, %v2168_v56 }
 0x20c   : > { %3479 = vmatmul.mubr.msk.f32.gmra.mrb[6].mxu1 %vm1550_vm6, %v2527_v0 }
 0x20d   : > { %3483 = vmatprep.mubr.msk.f32.mxu1 %vm1550_vm6, %v4364_v37 }
 0x210   : > { %3484 = vmatmul.mubr.msk.f32.vlgmr.msra.gmra.mrb[0].mxu1 %vm1550_vm6, %v4371_v40 }
 0x211   : > { %3486 = vmatprep.mubr.msk.f32.mxu1 %vm1550_vm6, %v4377_v43 }
 0x214   : > { %3487 = vmatmul.mubr.msk.f32.gmra.mrb[2].mxu1 %vm1550_vm6, %v4384_v46 }
 0x215   : > { %3489 = vmatprep.mubr.msk.f32.mxu1 %vm1550_vm6, %v4390_v48 }
 0x218   : > { %3490 = vmatmul.mubr.msk.f32.gmra.mrb[4].mxu1 %vm1550_vm6, %v4395_v49 }
 0x219   : > { %3492 = vmatprep.mubr.msk.f32.mxu1 %vm1550_vm6, %v2288_v61 }
 0x21c   : > { %3493 = vmatmul.mubr.msk.f32.gmra.mrb[6].mxu1 %vm1550_vm6, %v2647_v7 }
 0x2e3   : > { %v3485_v9 = vpop.f32.mrb[0].mxu1 }
 0x2e4   : > { %v2773_v12 = vadd.f32 %v3485_v9, %v3073_v8  ;;  %v2718_v13 = vpop.f32.mrb[1].mxu1 }
 0x2e5   : > { %v2772_v15 = vadd.f32 %v3073_v8, %v2718_v13 }
 0x2e6   : > { %v2781_v16 = vmax.f32 %v2773_v12, 0.0 }
 0x2e7   : > { %v2780_v5 = vmax.f32 %v2772_v15, 0.0  ;;  %v3488_v14 = vpop.f32.mrb[2].mxu1 }
 0x2e8   : > { %2789 = vst.msk [vmem:[%s217_s26 + $0x8] sm:$0xff] %vm1550_vm6, %v2781_v16  ;;  %v2775_v17 = vadd.f32 %v3488_v14, %v3073_v8  ;;  %v2728_v18 = vpop.f32.mrb[3].mxu1 }
 0x2e9   : > { %2788 = vst.msk [vmem:[%s217_s26] sm:$0xff] %vm1550_vm6, %v2780_v5  ;;  %v2774_v19 = vadd.f32 %v3073_v8, %v2728_v18 }
 0x2ea   : > { %v2783_v20 = vmax.f32 %v2775_v17, 0.0 }
 0x2eb   : > { %v2782_v21 = vmax.f32 %v2774_v19, 0.0  ;;  %v3491_v22 = vpop.f32.mrb[4].mxu1 }
 0x2ec   : > { %2791 = vst.msk [vmem:[%s217_s26 + $0x18] sm:$0xff] %vm1550_vm6, %v2783_v20  ;;  %v2777_v25 = vadd.f32 %v3491_v22, %v3073_v8  ;;  %v2738_v2 = vpop.f32.mrb[5].mxu1 }
 0x2ed   : > { %2790 = vst.msk [vmem:[%s217_s26 + $0x10] sm:$0xff] %vm1550_vm6, %v2782_v21  ;;  %v2776_v26 = vadd.f32 %v3073_v8, %v2738_v2 }
 0x2ee   : > { %v2785_v27 = vmax.f32 %v2777_v25, 0.0 }
 0x2ef   : > { %v2784_v1 = vmax.f32 %v2776_v26, 0.0  ;;  %v3494_v28 = vpop.f32.mrb[6].mxu1 }
 0x2f0   : > { %2793 = vst.msk [vmem:[%s217_s26 + $0x28] sm:$0xff] %vm1550_vm6, %v2785_v27  ;;  %v2779_v29 = vadd.f32 %v3494_v28, %v3073_v8  ;;  %v2748_v30 = vpop.f32.mrb[7].mxu1 }
 0x2f1   : > { %2792 = vst.msk [vmem:[%s217_s26 + $0x20] sm:$0xff] %vm1550_vm6, %v2784_v1  ;;  %v2778_v31 = vadd.f32 %v3073_v8, %v2748_v30 }
 0x2f2   : > { %v2787_v32 = vmax.f32 %v2779_v29, 0.0 }
 0x2f3   : > { %v2786_v33 = vmax.f32 %v2778_v31, 0.0 }
 0x2f4   : > { %2795 = vst.msk [vmem:[%s217_s26 + $0x38] sm:$0xff] %vm1550_vm6, %v2787_v32 }
 0x2f5   : > { %2794 = vst.msk [vmem:[%s217_s26 + $0x30] sm:$0xff] %vm1550_vm6, %v2786_v33 }
 0x2f6   : > { %3678 = shalt.err (!%p3675_p3)
}
 0x2f7   : > { %s3679_s14 = scalar_lea.hbm %s4517_s9, 1024  ;;  %s3683_s17 = scalar_lea.hbm %s4571_s5, 2048 }
 0x2f8   : > { %p3680_p4 = scmp.ne.s32.totalorder %s4517_s9, %s3679_s14  ;;  %p3684_p9 = scmp.lt.u32.totalorder %s4517_s9, %s4571_s5 }
 0x2f9   : > { %p3685_p10 = scmp.lt.u32.totalorder %s3683_s17, %s3679_s14  ;;  %p3687_p12 = scmp.lt.u32.totalorder %s3679_s14, %s4517_s9 }
 0x2fa   : > { %p3681_p7 = pnand %p3680_p4, %p3801_p5 }
 0x2fb   : > { %p3686_p11 = por %p3685_p10, %p3684_p9 }
 0x2fc   : > { %p3682_p8 = pneg %p3681_p7 }
 0x2fd   : > { %p3688_p13 = por %p3687_p12, %p3686_p11 }
 0x2ff   : > { %p3689_p0 = pnand %p3688_p13, %p3682_p8 }
 0x301   : > { %3692 = shalt.err (!%p3689_p0)
}
 0x302   : > { %s3731_s26 = smov 128   ;;  %s3732_s30 = smov 8  }
 0x303   : > { %3623 = dma.vmem_to_hbm [thread:$0]  (%p3801_p5), %s4519_s6, 1024, %s4517_s9, %s4525_s22, %s3731_s26, %s3731_s26, %s3732_s30  }
 0x304 PF: > { %p3629_p1 = scmp.ge.s32.totalorder %s3727_s21, 2  ;;  %s2825_s7 = sand.u32 1, %s3715_s18  }
 0x305   : > { %s2826_s8 = scalar_lea.sflag [#allocation5], %s2825_s7 }
 0x306   : > { %p3626_p2 = pnand %p3629_p1, %p3805_p6 }
 0x308   : > { %3710 = dma.done.wait (!%p3626_p2), %s2826_s8, 1024  }
 0x309   : > { %3712 = vsyncadd (!%p3626_p2), %s2826_s8, 4294966272  ;;  %p15_p3 = scmp.ge.s32.totalorder %s3788_s24, 4   ;;  %s4574_s18 = smov %s3719_s19 }
 0x30a   : > { %s4575_s19 = smov %s3723_s20  ;;  %s4576_s20 = smov %s3799_s27 }
 0x30b   : > { %s4577_s21 = smov %s3788_s24  ;;  %17 = sbr.rel (!%p15_p3) target bundleno = 3 (0x3), region = 98 }
 0x312   :  { %2831 = vsyncpa [#allocation5], 1 }
 0x313   :  { %2833 = vsyncpa [#allocation5 + $0x1], 1 }

</bundles_post_ra>
